<compile_context>
chip_gen: v7x
topology: tpu7x:2x2x1
jax: 0.10.0
libtpu: 0.0.40
codegen_flags: <defaults>
</compile_context>

<pallas_src>
import functools

import jax
import jax.numpy as jnp
from jax.experimental import pallas as pl
from jax.experimental.pallas import tpu as pltpu


def _round_up(x, m):
    return ((x + m - 1) // m) * m


def _cdiv(a, b):
    return -(-a // b)


def _vae_kernel(na, latent_dim,
                # scalar (SMEM)
                max_action_ref,
                # batch-tiled input slab [state | action | noise]  (f32)
                x_ref,
                # resident weights (bf16) / biases (f32)
                e1w_ref, e1b_ref,
                e2w_ref, e2b_ref,
                mlw_ref, mlb_ref,
                d1w_s_ref, d1w_z_ref, d1b_ref,
                d2w_ref, d2b_ref,
                d3w_ref, d3b_ref,
                # output slab [u | mean | std]
                out_ref):
    f32 = jnp.float32
    bf16 = jnp.bfloat16
    ma = max_action_ref[0]

    x = x_ref[...]                       # (bm, state+action+latent) f32
    x16 = x.astype(bf16)                 # shared MXU operand for e1 and d1(state)
    noise = x[:, na:]                    # (bm, latent) f32

    # ----- encoder -----
    # e1w has zero rows for the noise columns -> x16 @ e1w == [s,a] @ W_e1 exactly.
    h = jnp.dot(x16, e1w_ref[...], preferred_element_type=f32) + e1b_ref[...]
    h = jnp.maximum(h, 0.0)
    h = jnp.dot(h.astype(bf16), e2w_ref[...], preferred_element_type=f32) + e2b_ref[...]
    h = jnp.maximum(h, 0.0)

    # fused mean || log_std head: one matmul, split with static slices
    ml = jnp.dot(h.astype(bf16), mlw_ref[...], preferred_element_type=f32) + mlb_ref[...]
    mean = ml[:, :latent_dim]
    log_std = jnp.clip(ml[:, latent_dim:], -4.0, 15.0)
    std = jnp.exp(log_std)

    # reparameterization (kept in f32 -- v5e has no bf16 VPU/EUP)
    z = mean + std * noise

    # ----- decoder -----
    # d1(cat([s, z])): d1w_s has zero rows for the action/noise columns of x.
    d = (jnp.dot(x16, d1w_s_ref[...], preferred_element_type=f32)
         + jnp.dot(z.astype(bf16), d1w_z_ref[...], preferred_element_type=f32)
         + d1b_ref[...])
    d = jnp.maximum(d, 0.0)
    d = jnp.dot(d.astype(bf16), d2w_ref[...], preferred_element_type=f32) + d2b_ref[...]
    d = jnp.maximum(d, 0.0)
    u = ma * jnp.tanh(jnp.dot(d.astype(bf16), d3w_ref[...], preferred_element_type=f32)
                      + d3b_ref[...])

    # single writeback store: [u | mean | std]
    out_ref[...] = jnp.concatenate([u, mean, std], axis=-1)


def prepare_params(params, state_dim, action_dim, latent_dim,
                   weight_dtype=jnp.bfloat16):
    """One-time parameter prep: bf16 cast, hidden-dim padding to a multiple of 128,
    mean||log_std head fusion, d1 split, and zero-row extension of e1 / d1_state so
    the kernel consumes a single [state|action|noise] slab.  All exact."""
    f32 = jnp.float32
    h0 = params["e1w"].shape[1]
    h1 = params["e2w"].shape[1]
    h0p = _round_up(h0, 128)
    h1p = _round_up(h1, 128)
    in_width = state_dim + action_dim + latent_dim

    def pad_w(w, rows, cols):
        out = jnp.zeros((rows, cols), f32)
        out = out.at[:w.shape[0], :w.shape[1]].set(w.astype(f32))
        return out.astype(weight_dtype)

    def pad_b(b, cols):
        # padded bias entries are zero -> relu keeps padded lanes exactly zero
        out = jnp.zeros((1, cols), f32)
        return out.at[:, :b.shape[1]].set(b.astype(f32))

    mlw = jnp.concatenate([params["mw"], params["lw"]], axis=1)
    mlb = jnp.concatenate([params["mb"], params["lb"]], axis=1)

    tensors = (
        pad_w(params["e1w"], in_width, h0p),               # zero rows for noise cols
        pad_b(params["e1b"], h0p),
        pad_w(params["e2w"], h0p, h1p),
        pad_b(params["e2b"], h1p),
        pad_w(mlw, h1p, 2 * latent_dim),                   # fused mean||log_std head
        pad_b(mlb, 2 * latent_dim),
        pad_w(params["d1w"][:state_dim], in_width, h0p),   # zero rows: action+noise
        pad_w(params["d1w"][state_dim:], latent_dim, h0p),
        pad_b(params["d1b"], h0p),
        pad_w(params["d2w"], h0p, h1p),
        pad_b(params["d2b"], h1p),
        pad_w(params["d3w"], h1p, action_dim),
        pad_b(params["d3b"], action_dim),
    )
    return {
        "tensors": tensors,
        "state_dim": state_dim,
        "action_dim": action_dim,
        "latent_dim": latent_dim,
        "in_width": in_width,
        "h0p": h0p,
        "h1p": h1p,
    }


def vae_forward(state, action, noise, prepped, max_action, *, block_batch=512):
    """Fused VAE forward pass.  `prepped` comes from prepare_params()."""
    B = state.shape[0]
    sd = prepped["state_dim"]
    ad = prepped["action_dim"]
    ld = prepped["latent_dim"]
    in_width = prepped["in_width"]
    h0p, h1p = prepped["h0p"], prepped["h1p"]
    na = sd + ad
    out_width = ad + 2 * ld
    tensors = prepped["tensors"]

    assert state.shape[1] == sd and action.shape[1] == ad and noise.shape[1] == ld

    # --- batch tiling: minimize padding; keep >= 2 grid steps when possible so
    # v7x's two TensorCores both get work (one cheap extra step on v5e/v6e).
    n_tiles = max(1, _cdiv(B, block_batch))
    if n_tiles == 1 and B >= 16:
        n_tiles = 2
    bm = _round_up(_cdiv(B, n_tiles), 8)
    b_pad = bm * n_tiles

    # single input slab [state | action | noise] -> one HBM->VMEM stream per tile
    x = jnp.concatenate([state, action, noise], axis=1).astype(jnp.float32)
    if b_pad != B:
        x = jnp.pad(x, ((0, b_pad - B), (0, 0)))

    max_action_arr = jnp.full((1,), max_action, jnp.float32)

    # --- VMEM budget: resident weights (x2 if double-buffered) plus a handful of
    # (bm, hidden) f32 activation slabs; clamped to fit v7x's 64 MiB physical VMEM.
    weight_bytes = sum(int(t.size) * t.dtype.itemsize for t in tensors)
    act_bytes = 10 * bm * max(h0p, h1p) * 4
    vmem_limit = int(min(56 << 20,
                         max(16 << 20, 2 * weight_bytes + act_bytes + (4 << 20))))

    # --- advisory cost estimate so XLA overlaps wrapper concat/pad/slice with it
    flops = 2 * b_pad * (2 * in_width * h0p + 2 * h0p * h1p
                         + h1p * 2 * ld + ld * h0p + h1p * ad)
    cost = pl.CostEstimate(
        flops=int(flops),
        transcendentals=int(b_pad * (ld + ad)),
        bytes_accessed=int(weight_bytes + x.size * x.dtype.itemsize
                           + b_pad * out_width * 4),
    )

    kernel = functools.partial(_vae_kernel, na, ld)
    out_shape = jax.ShapeDtypeStruct((b_pad, out_width), jnp.float32)

    def run(weight_pipeline_mode):
        def weight_spec(arr):
            # whole array as one block, constant index -> stays resident in VMEM
            if weight_pipeline_mode is None:
                return pl.BlockSpec(arr.shape, lambda i: (0, 0))
            return pl.BlockSpec(arr.shape, lambda i: (0, 0),
                                pipeline_mode=weight_pipeline_mode)

        in_specs = (
            [pl.BlockSpec(memory_space=pltpu.MemorySpace.SMEM)]       # max_action
            + [pl.BlockSpec((bm, in_width), lambda i: (i, 0))]        # input slab
            + [weight_spec(t) for t in tensors]
        )
        return pl.pallas_call(
            kernel,
            out_shape=out_shape,
            grid=(n_tiles,),
            in_specs=in_specs,
            out_specs=pl.BlockSpec((bm, out_width), lambda i: (i, 0)),
            compiler_params=pltpu.CompilerParams(
                dimension_semantics=("parallel",),
                vmem_limit_bytes=vmem_limit),
            cost_estimate=cost,
        )(max_action_arr, x, *tensors)

    try:
        # resident weights single-buffered: no re-DMA across steps, half the VMEM
        out = run(pl.Buffered(1))
    except Exception:
        # Fallback for jax/Mosaic versions that reject single-buffered inputs.
        out = run(None)

    u = out[:B, :ad]
    mean = out[:B, ad:ad + ld]
    std = out[:B, ad + ld:]
    return u, mean, std


def _init_params(key, state_dim, action_dim, latent_dim, hidden_dims):
    """Deterministic param init (PyTorch-Linear-style uniform +/- 1/sqrt(fan_in))."""
    h0, h1 = hidden_dims

    def linear(key, fan_in, fan_out):
        kw, kb = jax.random.split(key)
        bound = 1.0 / jnp.sqrt(fan_in)
        w = jax.random.uniform(kw, (fan_in, fan_out), jnp.float32, -bound, bound)
        b = jax.random.uniform(kb, (1, fan_out), jnp.float32, -bound, bound)
        return w, b

    keys = jax.random.split(key, 7)
    p = {}
    p["e1w"], p["e1b"] = linear(keys[0], state_dim + action_dim, h0)
    p["e2w"], p["e2b"] = linear(keys[1], h0, h1)
    p["mw"], p["mb"] = linear(keys[2], h1, latent_dim)
    p["lw"], p["lb"] = linear(keys[3], h1, latent_dim)
    p["d1w"], p["d1b"] = linear(keys[4], state_dim + latent_dim, h0)
    p["d2w"], p["d2b"] = linear(keys[5], h0, h1)
    p["d3w"], p["d3b"] = linear(keys[6], h1, action_dim)
    return p


def _reference_forward(state, action, noise, params, max_action,
                       dot_dtype=jnp.float32):
    """Plain-JAX reference mirroring the PyTorch module.  dot_dtype=bfloat16 gives a
    matmul-dtype-matched reference for tight comparison against the kernel."""
    def mm(a, w):
        return jnp.dot(a.astype(dot_dtype), w.astype(dot_dtype),
                       preferred_element_type=jnp.float32)

    sd = state.shape[1]
    sa = jnp.concatenate([state, action], axis=1)
    h = jax.nn.relu(mm(sa, params["e1w"]) + params["e1b"])
    h = jax.nn.relu(mm(h, params["e2w"]) + params["e2b"])
    mean = mm(h, params["mw"]) + params["mb"]
    log_std = jnp.clip(mm(h, params["lw"]) + params["lb"], -4.0, 15.0)
    std = jnp.exp(log_std)
    z = mean + std * noise
    d = jax.nn.relu(mm(state, params["d1w"][:sd]) + mm(z, params["d1w"][sd:])
                    + params["d1b"])
    d = jax.nn.relu(mm(d, params["d2w"]) + params["d2b"])
    u = max_action * jnp.tanh(mm(d, params["d3w"]) + params["d3b"])
    return u, mean, std


if __name__ == "__main__":
    # small, forward-consistent shapes
    batch = 8
    state_dim = 12
    action_dim = 4
    latent_dim = 8          # typically 2 * action_dim in BCQ
    hidden_dims = [32, 32]  # scaled down from [750, 750]; padded to 128 internally
    max_action = 1.0

    key = jax.random.PRNGKey(0)
    k_state, k_action, k_noise, k_params = jax.random.split(key, 4)

    state = jax.random.normal(k_state, (batch, state_dim), jnp.float32)
    action = jax.random.normal(k_action, (batch, action_dim), jnp.float32)
    # noise replaces torch.FloatTensor(np.random.normal(0, 1, size=std.size()))
    noise = jax.random.normal(k_noise, (batch, latent_dim), jnp.float32)

    params = _init_params(k_params, state_dim, action_dim, latent_dim, hidden_dims)
    prepped = prepare_params(params, state_dim, action_dim, latent_dim)  # load-time

    u, mean, std = vae_forward(state, action, noise, prepped, max_action)
    jax.block_until_ready((u, mean, std))

    # tight check vs a reference that uses the same bf16 matmul operands
    u_b, mean_b, std_b = _reference_forward(state, action, noise, params,
                                            max_action, dot_dtype=jnp.bfloat16)
    assert jnp.allclose(u, u_b, atol=2e-3, rtol=2e-3), "u mismatch (bf16 ref)"
    assert jnp.allclose(mean, mean_b, atol=2e-3, rtol=2e-3), "mean mismatch (bf16 ref)"
    assert jnp.allclose(std, std_b, atol=2e-3, rtol=2e-3), "std mismatch (bf16 ref)"

    # loose check vs the original full-f32 semantics (bf16 matmul rounding only)
    u_f, mean_f, std_f = _reference_forward(state, action, noise, params,
                                            max_action, dot_dtype=jnp.float32)
    assert jnp.allclose(u, u_f, atol=5e-2, rtol=5e-2), "u mismatch (f32 ref)"
    assert jnp.allclose(mean, mean_f, atol=5e-2, rtol=5e-2), "mean mismatch (f32 ref)"
    assert jnp.allclose(std, std_f, atol=5e-2, rtol=5e-2), "std mismatch (f32 ref)"

    print("KERNEL_OK")
</pallas_src>

<mosaic_0001>
module attributes {stable_mosaic.version = 11 : i64} {
  func.func @_vae_kernel(%arg0: i32, %arg1: memref<1xf32, #tpu.memory_space<smem>>, %arg2: memref<8x24xf32, #tpu.memory_space<vmem>>, %arg3: memref<24x128xbf16, #tpu.memory_space<vmem>>, %arg4: memref<1x128xf32, #tpu.memory_space<vmem>>, %arg5: memref<128x128xbf16, #tpu.memory_space<vmem>>, %arg6: memref<1x128xf32, #tpu.memory_space<vmem>>, %arg7: memref<128x16xbf16, #tpu.memory_space<vmem>>, %arg8: memref<1x16xf32, #tpu.memory_space<vmem>>, %arg9: memref<24x128xbf16, #tpu.memory_space<vmem>>, %arg10: memref<8x128xbf16, #tpu.memory_space<vmem>>, %arg11: memref<1x128xf32, #tpu.memory_space<vmem>>, %arg12: memref<128x128xbf16, #tpu.memory_space<vmem>>, %arg13: memref<1x128xf32, #tpu.memory_space<vmem>>, %arg14: memref<128x4xbf16, #tpu.memory_space<vmem>>, %arg15: memref<1x4xf32, #tpu.memory_space<vmem>>, %arg16: memref<8x20xf32, #tpu.memory_space<vmem>>) attributes {dimension_semantics = [#tpu.dimension_semantics<parallel>], iteration_bounds = array<i64: 1>, scalar_prefetch = 0 : i64, scratch_operands = 0 : i64, tpu.core_type = #tpu.core_type<tc>, window_params = [{transform_indices = @transform_0, window_bounds = array<i64: 1>}, {transform_indices = @transform_1, window_bounds = array<i64: 8, 24>}, {pipeline_mode = #tpu.pipeline_mode<synchronous>, transform_indices = @transform_2, window_bounds = array<i64: 24, 128>}, {pipeline_mode = #tpu.pipeline_mode<synchronous>, transform_indices = @transform_3, window_bounds = array<i64: 1, 128>}, {pipeline_mode = #tpu.pipeline_mode<synchronous>, transform_indices = @transform_4, window_bounds = array<i64: 128, 128>}, {pipeline_mode = #tpu.pipeline_mode<synchronous>, transform_indices = @transform_5, window_bounds = array<i64: 1, 128>}, {pipeline_mode = #tpu.pipeline_mode<synchronous>, transform_indices = @transform_6, window_bounds = array<i64: 128, 16>}, {pipeline_mode = #tpu.pipeline_mode<synchronous>, transform_indices = @transform_7, window_bounds = array<i64: 1, 16>}, {pipeline_mode = #tpu.pipeline_mode<synchronous>, transform_indices = @transform_8, window_bounds = array<i64: 24, 128>}, {pipeline_mode = #tpu.pipeline_mode<synchronous>, transform_indices = @transform_9, window_bounds = array<i64: 8, 128>}, {pipeline_mode = #tpu.pipeline_mode<synchronous>, transform_indices = @transform_10, window_bounds = array<i64: 1, 128>}, {pipeline_mode = #tpu.pipeline_mode<synchronous>, transform_indices = @transform_11, window_bounds = array<i64: 128, 128>}, {pipeline_mode = #tpu.pipeline_mode<synchronous>, transform_indices = @transform_12, window_bounds = array<i64: 1, 128>}, {pipeline_mode = #tpu.pipeline_mode<synchronous>, transform_indices = @transform_13, window_bounds = array<i64: 128, 4>}, {pipeline_mode = #tpu.pipeline_mode<synchronous>, transform_indices = @transform_14, window_bounds = array<i64: 1, 4>}, {transform_indices = @transform_15, window_bounds = array<i64: 8, 20>}]} {
    %c0 = arith.constant 0 : index
    %0 = memref.load %arg1[%c0] : memref<1xf32, #tpu.memory_space<smem>>
    %c0_0 = arith.constant 0 : index
    %c0_1 = arith.constant 0 : index
    %1 = vector.load %arg2[%c0_0, %c0_1] : memref<8x24xf32, #tpu.memory_space<vmem>>, vector<8x24xf32>
    %2 = arith.truncf %1 : vector<8x24xf32> to vector<8x24xbf16>
    %3 = vector.extract_strided_slice %1 {offsets = [0, 16], sizes = [8, 8], strides = [1, 1]} : vector<8x24xf32> to vector<8x8xf32>
    %c0_2 = arith.constant 0 : index
    %c0_3 = arith.constant 0 : index
    %4 = vector.load %arg3[%c0_2, %c0_3] : memref<24x128xbf16, #tpu.memory_space<vmem>>, vector<24x128xbf16>
    %cst = arith.constant dense<0.000000e+00> : vector<8x128xf32>
    %5 = tpu.matmul %2, %4, %cst {dimension_numbers = #tpu.dot_dimension_numbers<[1], [0], [0], [1], [0, 0, 1, 1], [], []>} : vector<8x24xbf16>, vector<24x128xbf16>, vector<8x128xf32> -> vector<8x128xf32>
    %c0_4 = arith.constant 0 : index
    %c0_5 = arith.constant 0 : index
    %6 = vector.load %arg4[%c0_4, %c0_5] : memref<1x128xf32, #tpu.memory_space<vmem>>, vector<1x128xf32>
    %7 = vector.broadcast %6 : vector<1x128xf32> to vector<8x128xf32>
    %8 = arith.addf %5, %7 : vector<8x128xf32>
    %cst_6 = arith.constant 0.000000e+00 : f32
    %9 = vector.broadcast %cst_6 : f32 to vector<8x128xf32>
    %10 = arith.maximumf %8, %9 : vector<8x128xf32>
    %11 = arith.truncf %10 : vector<8x128xf32> to vector<8x128xbf16>
    %c0_7 = arith.constant 0 : index
    %c0_8 = arith.constant 0 : index
    %12 = vector.load %arg5[%c0_7, %c0_8] : memref<128x128xbf16, #tpu.memory_space<vmem>>, vector<128x128xbf16>
    %cst_9 = arith.constant dense<0.000000e+00> : vector<8x128xf32>
    %13 = tpu.matmul %11, %12, %cst_9 {dimension_numbers = #tpu.dot_dimension_numbers<[1], [0], [0], [1], [0, 0, 1, 1], [], []>} : vector<8x128xbf16>, vector<128x128xbf16>, vector<8x128xf32> -> vector<8x128xf32>
    %c0_10 = arith.constant 0 : index
    %c0_11 = arith.constant 0 : index
    %14 = vector.load %arg6[%c0_10, %c0_11] : memref<1x128xf32, #tpu.memory_space<vmem>>, vector<1x128xf32>
    %15 = vector.broadcast %14 : vector<1x128xf32> to vector<8x128xf32>
    %16 = arith.addf %13, %15 : vector<8x128xf32>
    %cst_12 = arith.constant 0.000000e+00 : f32
    %17 = vector.broadcast %cst_12 : f32 to vector<8x128xf32>
    %18 = arith.maximumf %16, %17 : vector<8x128xf32>
    %19 = arith.truncf %18 : vector<8x128xf32> to vector<8x128xbf16>
    %c0_13 = arith.constant 0 : index
    %c0_14 = arith.constant 0 : index
    %20 = vector.load %arg7[%c0_13, %c0_14] : memref<128x16xbf16, #tpu.memory_space<vmem>>, vector<128x16xbf16>
    %cst_15 = arith.constant dense<0.000000e+00> : vector<8x16xf32>
    %21 = tpu.matmul %19, %20, %cst_15 {dimension_numbers = #tpu.dot_dimension_numbers<[1], [0], [0], [1], [0, 0, 1, 1], [], []>} : vector<8x128xbf16>, vector<128x16xbf16>, vector<8x16xf32> -> vector<8x16xf32>
    %c0_16 = arith.constant 0 : index
    %c0_17 = arith.constant 0 : index
    %22 = vector.load %arg8[%c0_16, %c0_17] : memref<1x16xf32, #tpu.memory_space<vmem>>, vector<1x16xf32>
    %23 = vector.broadcast %22 : vector<1x16xf32> to vector<8x16xf32>
    %24 = arith.addf %21, %23 : vector<8x16xf32>
    %25 = vector.extract_strided_slice %24 {offsets = [0, 0], sizes = [8, 8], strides = [1, 1]} : vector<8x16xf32> to vector<8x8xf32>
    %26 = vector.extract_strided_slice %24 {offsets = [0, 8], sizes = [8, 8], strides = [1, 1]} : vector<8x16xf32> to vector<8x8xf32>
    %cst_18 = arith.constant -4.000000e+00 : f32
    %cst_19 = arith.constant 1.500000e+01 : f32
    %27 = vector.broadcast %cst_18 : f32 to vector<8x8xf32>
    %28 = arith.maximumf %27, %26 : vector<8x8xf32>
    %29 = vector.broadcast %cst_19 : f32 to vector<8x8xf32>
    %30 = arith.minimumf %29, %28 : vector<8x8xf32>
    %31 = math.exp %30 : vector<8x8xf32>
    %32 = arith.mulf %31, %3 : vector<8x8xf32>
    %33 = arith.addf %25, %32 : vector<8x8xf32>
    %c0_20 = arith.constant 0 : index
    %c0_21 = arith.constant 0 : index
    %34 = vector.load %arg9[%c0_20, %c0_21] : memref<24x128xbf16, #tpu.memory_space<vmem>>, vector<24x128xbf16>
    %cst_22 = arith.constant dense<0.000000e+00> : vector<8x128xf32>
    %35 = tpu.matmul %2, %34, %cst_22 {dimension_numbers = #tpu.dot_dimension_numbers<[1], [0], [0], [1], [0, 0, 1, 1], [], []>} : vector<8x24xbf16>, vector<24x128xbf16>, vector<8x128xf32> -> vector<8x128xf32>
    %36 = arith.truncf %33 : vector<8x8xf32> to vector<8x8xbf16>
    %c0_23 = arith.constant 0 : index
    %c0_24 = arith.constant 0 : index
    %37 = vector.load %arg10[%c0_23, %c0_24] : memref<8x128xbf16, #tpu.memory_space<vmem>>, vector<8x128xbf16>
    %cst_25 = arith.constant dense<0.000000e+00> : vector<8x128xf32>
    %38 = tpu.matmul %36, %37, %cst_25 {dimension_numbers = #tpu.dot_dimension_numbers<[1], [0], [0], [1], [0, 0, 1, 1], [], []>} : vector<8x8xbf16>, vector<8x128xbf16>, vector<8x128xf32> -> vector<8x128xf32>
    %39 = arith.addf %35, %38 : vector<8x128xf32>
    %c0_26 = arith.constant 0 : index
    %c0_27 = arith.constant 0 : index
    %40 = vector.load %arg11[%c0_26, %c0_27] : memref<1x128xf32, #tpu.memory_space<vmem>>, vector<1x128xf32>
    %41 = vector.broadcast %40 : vector<1x128xf32> to vector<8x128xf32>
    %42 = arith.addf %39, %41 : vector<8x128xf32>
    %cst_28 = arith.constant 0.000000e+00 : f32
    %43 = vector.broadcast %cst_28 : f32 to vector<8x128xf32>
    %44 = arith.maximumf %42, %43 : vector<8x128xf32>
    %45 = arith.truncf %44 : vector<8x128xf32> to vector<8x128xbf16>
    %c0_29 = arith.constant 0 : index
    %c0_30 = arith.constant 0 : index
    %46 = vector.load %arg12[%c0_29, %c0_30] : memref<128x128xbf16, #tpu.memory_space<vmem>>, vector<128x128xbf16>
    %cst_31 = arith.constant dense<0.000000e+00> : vector<8x128xf32>
    %47 = tpu.matmul %45, %46, %cst_31 {dimension_numbers = #tpu.dot_dimension_numbers<[1], [0], [0], [1], [0, 0, 1, 1], [], []>} : vector<8x128xbf16>, vector<128x128xbf16>, vector<8x128xf32> -> vector<8x128xf32>
    %c0_32 = arith.constant 0 : index
    %c0_33 = arith.constant 0 : index
    %48 = vector.load %arg13[%c0_32, %c0_33] : memref<1x128xf32, #tpu.memory_space<vmem>>, vector<1x128xf32>
    %49 = vector.broadcast %48 : vector<1x128xf32> to vector<8x128xf32>
    %50 = arith.addf %47, %49 : vector<8x128xf32>
    %cst_34 = arith.constant 0.000000e+00 : f32
    %51 = vector.broadcast %cst_34 : f32 to vector<8x128xf32>
    %52 = arith.maximumf %50, %51 : vector<8x128xf32>
    %53 = arith.truncf %52 : vector<8x128xf32> to vector<8x128xbf16>
    %c0_35 = arith.constant 0 : index
    %c0_36 = arith.constant 0 : index
    %54 = vector.load %arg14[%c0_35, %c0_36] : memref<128x4xbf16, #tpu.memory_space<vmem>>, vector<128x4xbf16>
    %cst_37 = arith.constant dense<0.000000e+00> : vector<8x4xf32>
    %55 = tpu.matmul %53, %54, %cst_37 {dimension_numbers = #tpu.dot_dimension_numbers<[1], [0], [0], [1], [0, 0, 1, 1], [], []>} : vector<8x128xbf16>, vector<128x4xbf16>, vector<8x4xf32> -> vector<8x4xf32>
    %c0_38 = arith.constant 0 : index
    %c0_39 = arith.constant 0 : index
    %56 = vector.load %arg15[%c0_38, %c0_39] : memref<1x4xf32, #tpu.memory_space<vmem>>, vector<1x4xf32>
    %57 = vector.broadcast %56 : vector<1x4xf32> to vector<8x4xf32>
    %58 = arith.addf %55, %57 : vector<8x4xf32>
    %59 = math.tanh %58 : vector<8x4xf32>
    %60 = vector.broadcast %0 : f32 to vector<8x4xf32>
    %61 = arith.mulf %60, %59 : vector<8x4xf32>
    %62 = tpu.concatenate %61, %25, %31 in 1 : vector<8x4xf32>, vector<8x8xf32>, vector<8x8xf32> -> vector<8x20xf32>
    %c0_40 = arith.constant 0 : index
    %c0_41 = arith.constant 0 : index
    %63 = vector.load %arg16[%c0_40, %c0_41] : memref<8x20xf32, #tpu.memory_space<vmem>>, vector<8x20xf32>
    tpu.vector_store %arg16[%c0_40, %c0_41], %62 {strides = array<i32>} : memref<8x20xf32, #tpu.memory_space<vmem>>, vector<8x20xf32>,
    return
  }
  func.func @transform_0(%arg0: i32) -> i32 {
    %c0_i32 = arith.constant 0 : i32
    %c0_i32_0 = arith.constant 0 : i32
    return %c0_i32 : i32
  }
  func.func @transform_1(%arg0: i32) -> (i32, i32) {
    %c0_i32 = arith.constant 0 : i32
    %c0_i32_0 = arith.constant 0 : i32
    return %arg0, %c0_i32 : i32, i32
  }
  func.func @transform_2(%arg0: i32) -> (i32, i32) {
    %c0_i32 = arith.constant 0 : i32
    %c0_i32_0 = arith.constant 0 : i32
    %c0_i32_1 = arith.constant 0 : i32
    return %c0_i32, %c0_i32_0 : i32, i32
  }
  func.func @transform_3(%arg0: i32) -> (i32, i32) {
    %c0_i32 = arith.constant 0 : i32
    %c0_i32_0 = arith.constant 0 : i32
    %c0_i32_1 = arith.constant 0 : i32
    return %c0_i32, %c0_i32_0 : i32, i32
  }
  func.func @transform_4(%arg0: i32) -> (i32, i32) {
    %c0_i32 = arith.constant 0 : i32
    %c0_i32_0 = arith.constant 0 : i32
    %c0_i32_1 = arith.constant 0 : i32
    return %c0_i32, %c0_i32_0 : i32, i32
  }
  func.func @transform_5(%arg0: i32) -> (i32, i32) {
    %c0_i32 = arith.constant 0 : i32
    %c0_i32_0 = arith.constant 0 : i32
    %c0_i32_1 = arith.constant 0 : i32
    return %c0_i32, %c0_i32_0 : i32, i32
  }
  func.func @transform_6(%arg0: i32) -> (i32, i32) {
    %c0_i32 = arith.constant 0 : i32
    %c0_i32_0 = arith.constant 0 : i32
    %c0_i32_1 = arith.constant 0 : i32
    return %c0_i32, %c0_i32_0 : i32, i32
  }
  func.func @transform_7(%arg0: i32) -> (i32, i32) {
    %c0_i32 = arith.constant 0 : i32
    %c0_i32_0 = arith.constant 0 : i32
    %c0_i32_1 = arith.constant 0 : i32
    return %c0_i32, %c0_i32_0 : i32, i32
  }
  func.func @transform_8(%arg0: i32) -> (i32, i32) {
    %c0_i32 = arith.constant 0 : i32
    %c0_i32_0 = arith.constant 0 : i32
    %c0_i32_1 = arith.constant 0 : i32
    return %c0_i32, %c0_i32_0 : i32, i32
  }
  func.func @transform_9(%arg0: i32) -> (i32, i32) {
    %c0_i32 = arith.constant 0 : i32
    %c0_i32_0 = arith.constant 0 : i32
    %c0_i32_1 = arith.constant 0 : i32
    return %c0_i32, %c0_i32_0 : i32, i32
  }
  func.func @transform_10(%arg0: i32) -> (i32, i32) {
    %c0_i32 = arith.constant 0 : i32
    %c0_i32_0 = arith.constant 0 : i32
    %c0_i32_1 = arith.constant 0 : i32
    return %c0_i32, %c0_i32_0 : i32, i32
  }
  func.func @transform_11(%arg0: i32) -> (i32, i32) {
    %c0_i32 = arith.constant 0 : i32
    %c0_i32_0 = arith.constant 0 : i32
    %c0_i32_1 = arith.constant 0 : i32
    return %c0_i32, %c0_i32_0 : i32, i32
  }
  func.func @transform_12(%arg0: i32) -> (i32, i32) {
    %c0_i32 = arith.constant 0 : i32
    %c0_i32_0 = arith.constant 0 : i32
    %c0_i32_1 = arith.constant 0 : i32
    return %c0_i32, %c0_i32_0 : i32, i32
  }
  func.func @transform_13(%arg0: i32) -> (i32, i32) {
    %c0_i32 = arith.constant 0 : i32
    %c0_i32_0 = arith.constant 0 : i32
    %c0_i32_1 = arith.constant 0 : i32
    return %c0_i32, %c0_i32_0 : i32, i32
  }
  func.func @transform_14(%arg0: i32) -> (i32, i32) {
    %c0_i32 = arith.constant 0 : i32
    %c0_i32_0 = arith.constant 0 : i32
    %c0_i32_1 = arith.constant 0 : i32
    return %c0_i32, %c0_i32_0 : i32, i32
  }
  func.func @transform_15(%arg0: i32) -> (i32, i32) {
    %c0_i32 = arith.constant 0 : i32
    %c0_i32_0 = arith.constant 0 : i32
    return %arg0, %c0_i32 : i32, i32
  }
}

module attributes {stable_mosaic.version = 11 : i64} {
  func.func @_vae_kernel(%arg0: i32, %arg1: memref<1xf32, #tpu.memory_space<smem>>, %arg2: memref<8x24xf32, #tpu.memory_space<vmem>>, %arg3: memref<24x128xbf16, #tpu.memory_space<vmem>>, %arg4: memref<1x128xf32, #tpu.memory_space<vmem>>, %arg5: memref<128x128xbf16, #tpu.memory_space<vmem>>, %arg6: memref<1x128xf32, #tpu.memory_space<vmem>>, %arg7: memref<128x16xbf16, #tpu.memory_space<vmem>>, %arg8: memref<1x16xf32, #tpu.memory_space<vmem>>, %arg9: memref<24x128xbf16, #tpu.memory_space<vmem>>, %arg10: memref<8x128xbf16, #tpu.memory_space<vmem>>, %arg11: memref<1x128xf32, #tpu.memory_space<vmem>>, %arg12: memref<128x128xbf16, #tpu.memory_space<vmem>>, %arg13: memref<1x128xf32, #tpu.memory_space<vmem>>, %arg14: memref<128x4xbf16, #tpu.memory_space<vmem>>, %arg15: memref<1x4xf32, #tpu.memory_space<vmem>>, %arg16: memref<8x20xf32, #tpu.memory_space<vmem>>) attributes {dimension_semantics = [#tpu.dimension_semantics<parallel>], iteration_bounds = array<i64: 1>, scalar_prefetch = 0 : i64, scratch_operands = 0 : i64, tpu.core_type = #tpu.core_type<tc>, window_params = [{transform_indices = @transform_0, window_bounds = array<i64: 1>}, {transform_indices = @transform_1, window_bounds = array<i64: 8, 24>}, {pipeline_mode = #tpu.pipeline_mode<synchronous>, transform_indices = @transform_2, window_bounds = array<i64: 24, 128>}, {pipeline_mode = #tpu.pipeline_mode<synchronous>, transform_indices = @transform_3, window_bounds = array<i64: 1, 128>}, {pipeline_mode = #tpu.pipeline_mode<synchronous>, transform_indices = @transform_4, window_bounds = array<i64: 128, 128>}, {pipeline_mode = #tpu.pipeline_mode<synchronous>, transform_indices = @transform_5, window_bounds = array<i64: 1, 128>}, {pipeline_mode = #tpu.pipeline_mode<synchronous>, transform_indices = @transform_6, window_bounds = array<i64: 128, 16>}, {pipeline_mode = #tpu.pipeline_mode<synchronous>, transform_indices = @transform_7, window_bounds = array<i64: 1, 16>}, {pipeline_mode = #tpu.pipeline_mode<synchronous>, transform_indices = @transform_8, window_bounds = array<i64: 24, 128>}, {pipeline_mode = #tpu.pipeline_mode<synchronous>, transform_indices = @transform_9, window_bounds = array<i64: 8, 128>}, {pipeline_mode = #tpu.pipeline_mode<synchronous>, transform_indices = @transform_10, window_bounds = array<i64: 1, 128>}, {pipeline_mode = #tpu.pipeline_mode<synchronous>, transform_indices = @transform_11, window_bounds = array<i64: 128, 128>}, {pipeline_mode = #tpu.pipeline_mode<synchronous>, transform_indices = @transform_12, window_bounds = array<i64: 1, 128>}, {pipeline_mode = #tpu.pipeline_mode<synchronous>, transform_indices = @transform_13, window_bounds = array<i64: 128, 4>}, {pipeline_mode = #tpu.pipeline_mode<synchronous>, transform_indices = @transform_14, window_bounds = array<i64: 1, 4>}, {transform_indices = @transform_15, window_bounds = array<i64: 8, 20>}]} {
    %c0 = arith.constant 0 : index
    %0 = memref.load %arg1[%c0] : memref<1xf32, #tpu.memory_space<smem>>
    %c0_0 = arith.constant 0 : index
    %c0_1 = arith.constant 0 : index
    %1 = vector.load %arg2[%c0_0, %c0_1] : memref<8x24xf32, #tpu.memory_space<vmem>>, vector<8x24xf32>
    %2 = arith.truncf %1 : vector<8x24xf32> to vector<8x24xbf16>
    %3 = vector.extract_strided_slice %1 {offsets = [0, 16], sizes = [8, 8], strides = [1, 1]} : vector<8x24xf32> to vector<8x8xf32>
    %c0_2 = arith.constant 0 : index
    %c0_3 = arith.constant 0 : index
    %4 = vector.load %arg3[%c0_2, %c0_3] : memref<24x128xbf16, #tpu.memory_space<vmem>>, vector<24x128xbf16>
    %cst = arith.constant dense<0.000000e+00> : vector<8x128xf32>
    %5 = tpu.matmul %2, %4, %cst {dimension_numbers = #tpu.dot_dimension_numbers<[1], [0], [0], [1], [0, 0, 1, 1], [], []>} : vector<8x24xbf16>, vector<24x128xbf16>, vector<8x128xf32> -> vector<8x128xf32>
    %c0_4 = arith.constant 0 : index
    %c0_5 = arith.constant 0 : index
    %6 = vector.load %arg4[%c0_4, %c0_5] : memref<1x128xf32, #tpu.memory_space<vmem>>, vector<1x128xf32>
    %7 = vector.broadcast %6 : vector<1x128xf32> to vector<8x128xf32>
    %8 = arith.addf %5, %7 : vector<8x128xf32>
    %cst_6 = arith.constant 0.000000e+00 : f32
    %9 = vector.broadcast %cst_6 : f32 to vector<8x128xf32>
    %10 = arith.maximumf %8, %9 : vector<8x128xf32>
    %11 = arith.truncf %10 : vector<8x128xf32> to vector<8x128xbf16>
    %c0_7 = arith.constant 0 : index
    %c0_8 = arith.constant 0 : index
    %12 = vector.load %arg5[%c0_7, %c0_8] : memref<128x128xbf16, #tpu.memory_space<vmem>>, vector<128x128xbf16>
    %cst_9 = arith.constant dense<0.000000e+00> : vector<8x128xf32>
    %13 = tpu.matmul %11, %12, %cst_9 {dimension_numbers = #tpu.dot_dimension_numbers<[1], [0], [0], [1], [0, 0, 1, 1], [], []>} : vector<8x128xbf16>, vector<128x128xbf16>, vector<8x128xf32> -> vector<8x128xf32>
    %c0_10 = arith.constant 0 : index
    %c0_11 = arith.constant 0 : index
    %14 = vector.load %arg6[%c0_10, %c0_11] : memref<1x128xf32, #tpu.memory_space<vmem>>, vector<1x128xf32>
    %15 = vector.broadcast %14 : vector<1x128xf32> to vector<8x128xf32>
    %16 = arith.addf %13, %15 : vector<8x128xf32>
    %cst_12 = arith.constant 0.000000e+00 : f32
    %17 = vector.broadcast %cst_12 : f32 to vector<8x128xf32>
    %18 = arith.maximumf %16, %17 : vector<8x128xf32>
    %19 = arith.truncf %18 : vector<8x128xf32> to vector<8x128xbf16>
    %c0_13 = arith.constant 0 : index
    %c0_14 = arith.constant 0 : index
    %20 = vector.load %arg7[%c0_13, %c0_14] : memref<128x16xbf16, #tpu.memory_space<vmem>>, vector<128x16xbf16>
    %cst_15 = arith.constant dense<0.000000e+00> : vector<8x16xf32>
    %21 = tpu.matmul %19, %20, %cst_15 {dimension_numbers = #tpu.dot_dimension_numbers<[1], [0], [0], [1], [0, 0, 1, 1], [], []>} : vector<8x128xbf16>, vector<128x16xbf16>, vector<8x16xf32> -> vector<8x16xf32>
    %c0_16 = arith.constant 0 : index
    %c0_17 = arith.constant 0 : index
    %22 = vector.load %arg8[%c0_16, %c0_17] : memref<1x16xf32, #tpu.memory_space<vmem>>, vector<1x16xf32>
    %23 = vector.broadcast %22 : vector<1x16xf32> to vector<8x16xf32>
    %24 = arith.addf %21, %23 : vector<8x16xf32>
    %25 = vector.extract_strided_slice %24 {offsets = [0, 0], sizes = [8, 8], strides = [1, 1]} : vector<8x16xf32> to vector<8x8xf32>
    %26 = vector.extract_strided_slice %24 {offsets = [0, 8], sizes = [8, 8], strides = [1, 1]} : vector<8x16xf32> to vector<8x8xf32>
    %cst_18 = arith.constant -4.000000e+00 : f32
    %cst_19 = arith.constant 1.500000e+01 : f32
    %27 = vector.broadcast %cst_18 : f32 to vector<8x8xf32>
    %28 = arith.maximumf %27, %26 : vector<8x8xf32>
    %29 = vector.broadcast %cst_19 : f32 to vector<8x8xf32>
    %30 = arith.minimumf %29, %28 : vector<8x8xf32>
    %31 = math.exp %30 : vector<8x8xf32>
    %32 = arith.mulf %31, %3 : vector<8x8xf32>
    %33 = arith.addf %25, %32 : vector<8x8xf32>
    %c0_20 = arith.constant 0 : index
    %c0_21 = arith.constant 0 : index
    %34 = vector.load %arg9[%c0_20, %c0_21] : memref<24x128xbf16, #tpu.memory_space<vmem>>, vector<24x128xbf16>
    %cst_22 = arith.constant dense<0.000000e+00> : vector<8x128xf32>
    %35 = tpu.matmul %2, %34, %cst_22 {dimension_numbers = #tpu.dot_dimension_numbers<[1], [0], [0], [1], [0, 0, 1, 1], [], []>} : vector<8x24xbf16>, vector<24x128xbf16>, vector<8x128xf32> -> vector<8x128xf32>
    %36 = arith.truncf %33 : vector<8x8xf32> to vector<8x8xbf16>
    %c0_23 = arith.constant 0 : index
    %c0_24 = arith.constant 0 : index
    %37 = vector.load %arg10[%c0_23, %c0_24] : memref<8x128xbf16, #tpu.memory_space<vmem>>, vector<8x128xbf16>
    %cst_25 = arith.constant dense<0.000000e+00> : vector<8x128xf32>
    %38 = tpu.matmul %36, %37, %cst_25 {dimension_numbers = #tpu.dot_dimension_numbers<[1], [0], [0], [1], [0, 0, 1, 1], [], []>} : vector<8x8xbf16>, vector<8x128xbf16>, vector<8x128xf32> -> vector<8x128xf32>
    %39 = arith.addf %35, %38 : vector<8x128xf32>
    %c0_26 = arith.constant 0 : index
    %c0_27 = arith.constant 0 : index
    %40 = vector.load %arg11[%c0_26, %c0_27] : memref<1x128xf32, #tpu.memory_space<vmem>>, vector<1x128xf32>
    %41 = vector.broadcast %40 : vector<1x128xf32> to vector<8x128xf32>
    %42 = arith.addf %39, %41 : vector<8x128xf32>
    %cst_28 = arith.constant 0.000000e+00 : f32
    %43 = vector.broadcast %cst_28 : f32 to vector<8x128xf32>
    %44 = arith.maximumf %42, %43 : vector<8x128xf32>
    %45 = arith.truncf %44 : vector<8x128xf32> to vector<8x128xbf16>
    %c0_29 = arith.constant 0 : index
    %c0_30 = arith.constant 0 : index
    %46 = vector.load %arg12[%c0_29, %c0_30] : memref<128x128xbf16, #tpu.memory_space<vmem>>, vector<128x128xbf16>
    %cst_31 = arith.constant dense<0.000000e+00> : vector<8x128xf32>
    %47 = tpu.matmul %45, %46, %cst_31 {dimension_numbers = #tpu.dot_dimension_numbers<[1], [0], [0], [1], [0, 0, 1, 1], [], []>} : vector<8x128xbf16>, vector<128x128xbf16>, vector<8x128xf32> -> vector<8x128xf32>
    %c0_32 = arith.constant 0 : index
    %c0_33 = arith.constant 0 : index
    %48 = vector.load %arg13[%c0_32, %c0_33] : memref<1x128xf32, #tpu.memory_space<vmem>>, vector<1x128xf32>
    %49 = vector.broadcast %48 : vector<1x128xf32> to vector<8x128xf32>
    %50 = arith.addf %47, %49 : vector<8x128xf32>
    %cst_34 = arith.constant 0.000000e+00 : f32
    %51 = vector.broadcast %cst_34 : f32 to vector<8x128xf32>
    %52 = arith.maximumf %50, %51 : vector<8x128xf32>
    %53 = arith.truncf %52 : vector<8x128xf32> to vector<8x128xbf16>
    %c0_35 = arith.constant 0 : index
    %c0_36 = arith.constant 0 : index
    %54 = vector.load %arg14[%c0_35, %c0_36] : memref<128x4xbf16, #tpu.memory_space<vmem>>, vector<128x4xbf16>
    %cst_37 = arith.constant dense<0.000000e+00> : vector<8x4xf32>
    %55 = tpu.matmul %53, %54, %cst_37 {dimension_numbers = #tpu.dot_dimension_numbers<[1], [0], [0], [1], [0, 0, 1, 1], [], []>} : vector<8x128xbf16>, vector<128x4xbf16>, vector<8x4xf32> -> vector<8x4xf32>
    %c0_38 = arith.constant 0 : index
    %c0_39 = arith.constant 0 : index
    %56 = vector.load %arg15[%c0_38, %c0_39] : memref<1x4xf32, #tpu.memory_space<vmem>>, vector<1x4xf32>
    %57 = vector.broadcast %56 : vector<1x4xf32> to vector<8x4xf32>
    %58 = arith.addf %55, %57 : vector<8x4xf32>
    %59 = math.tanh %58 : vector<8x4xf32>
    %60 = vector.broadcast %0 : f32 to vector<8x4xf32>
    %61 = arith.mulf %60, %59 : vector<8x4xf32>
    %62 = tpu.concatenate %61, %25, %31 in 1 : vector<8x4xf32>, vector<8x8xf32>, vector<8x8xf32> -> vector<8x20xf32>
    %c0_40 = arith.constant 0 : index
    %c0_41 = arith.constant 0 : index
    %63 = vector.load %arg16[%c0_40, %c0_41] : memref<8x20xf32, #tpu.memory_space<vmem>>, vector<8x20xf32>
    tpu.vector_store %arg16[%c0_40, %c0_41], %62 {strides = array<i32>} : memref<8x20xf32, #tpu.memory_space<vmem>>, vector<8x20xf32>,
    return
  }
  func.func @transform_0(%arg0: i32) -> i32 {
    %c0_i32 = arith.constant 0 : i32
    %c0_i32_0 = arith.constant 0 : i32
    return %c0_i32 : i32
  }
  func.func @transform_1(%arg0: i32) -> (i32, i32) {
    %c0_i32 = arith.constant 0 : i32
    %c0_i32_0 = arith.constant 0 : i32
    return %arg0, %c0_i32 : i32, i32
  }
  func.func @transform_2(%arg0: i32) -> (i32, i32) {
    %c0_i32 = arith.constant 0 : i32
    %c0_i32_0 = arith.constant 0 : i32
    %c0_i32_1 = arith.constant 0 : i32
    return %c0_i32, %c0_i32_0 : i32, i32
  }
  func.func @transform_3(%arg0: i32) -> (i32, i32) {
    %c0_i32 = arith.constant 0 : i32
    %c0_i32_0 = arith.constant 0 : i32
    %c0_i32_1 = arith.constant 0 : i32
    return %c0_i32, %c0_i32_0 : i32, i32
  }
  func.func @transform_4(%arg0: i32) -> (i32, i32) {
    %c0_i32 = arith.constant 0 : i32
    %c0_i32_0 = arith.constant 0 : i32
    %c0_i32_1 = arith.constant 0 : i32
    return %c0_i32, %c0_i32_0 : i32, i32
  }
  func.func @transform_5(%arg0: i32) -> (i32, i32) {
    %c0_i32 = arith.constant 0 : i32
    %c0_i32_0 = arith.constant 0 : i32
    %c0_i32_1 = arith.constant 0 : i32
    return %c0_i32, %c0_i32_0 : i32, i32
  }
  func.func @transform_6(%arg0: i32) -> (i32, i32) {
    %c0_i32 = arith.constant 0 : i32
    %c0_i32_0 = arith.constant 0 : i32
    %c0_i32_1 = arith.constant 0 : i32
    return %c0_i32, %c0_i32_0 : i32, i32
  }
  func.func @transform_7(%arg0: i32) -> (i32, i32) {
    %c0_i32 = arith.constant 0 : i32
    %c0_i32_0 = arith.constant 0 : i32
    %c0_i32_1 = arith.constant 0 : i32
    return %c0_i32, %c0_i32_0 : i32, i32
  }
  func.func @transform_8(%arg0: i32) -> (i32, i32) {
    %c0_i32 = arith.constant 0 : i32
    %c0_i32_0 = arith.constant 0 : i32
    %c0_i32_1 = arith.constant 0 : i32
    return %c0_i32, %c0_i32_0 : i32, i32
  }
  func.func @transform_9(%arg0: i32) -> (i32, i32) {
    %c0_i32 = arith.constant 0 : i32
    %c0_i32_0 = arith.constant 0 : i32
    %c0_i32_1 = arith.constant 0 : i32
    return %c0_i32, %c0_i32_0 : i32, i32
  }
  func.func @transform_10(%arg0: i32) -> (i32, i32) {
    %c0_i32 = arith.constant 0 : i32
    %c0_i32_0 = arith.constant 0 : i32
    %c0_i32_1 = arith.constant 0 : i32
    return %c0_i32, %c0_i32_0 : i32, i32
  }
  func.func @transform_11(%arg0: i32) -> (i32, i32) {
    %c0_i32 = arith.constant 0 : i32
    %c0_i32_0 = arith.constant 0 : i32
    %c0_i32_1 = arith.constant 0 : i32
    return %c0_i32, %c0_i32_0 : i32, i32
  }
  func.func @transform_12(%arg0: i32) -> (i32, i32) {
    %c0_i32 = arith.constant 0 : i32
    %c0_i32_0 = arith.constant 0 : i32
    %c0_i32_1 = arith.constant 0 : i32
    return %c0_i32, %c0_i32_0 : i32, i32
  }
  func.func @transform_13(%arg0: i32) -> (i32, i32) {
    %c0_i32 = arith.constant 0 : i32
    %c0_i32_0 = arith.constant 0 : i32
    %c0_i32_1 = arith.constant 0 : i32
    return %c0_i32, %c0_i32_0 : i32, i32
  }
  func.func @transform_14(%arg0: i32) -> (i32, i32) {
    %c0_i32 = arith.constant 0 : i32
    %c0_i32_0 = arith.constant 0 : i32
    %c0_i32_1 = arith.constant 0 : i32
    return %c0_i32, %c0_i32_0 : i32, i32
  }
  func.func @transform_15(%arg0: i32) -> (i32, i32) {
    %c0_i32 = arith.constant 0 : i32
    %c0_i32_0 = arith.constant 0 : i32
    return %arg0, %c0_i32 : i32, i32
  }
}

</mosaic_0001>

<bundles_post_ra>
// kernel: tpu_custom_call.1
= control target key start
LH: loop header
LB: loop body
LE: loop exit
PB: predicated region body
PF: predicated region fallthrough
CT: control target
= control target key end

     0   :  { %21 = vsyncpa [#allocation4], 0  ;;  %s1479_s0 = inlined_call_operand.<no memory space> [shape: f32[1], index: 0, kind: input, shape index: {}]   ;;  %s1480_s1 = inlined_call_operand.hbm [shape: f32[8,24], index: 1, kind: input, shape index: {}]   ;;  %s1481_s2 = inlined_call_operand.vmem [shape: bf16[24,128], index: 2, kind: input, shape index: {}]   ;;  %s1482_s3 = inlined_call_operand.hbm [shape: f32[1,128], index: 3, kind: input, shape index: {}]   ;;  %s1483_s4 = inlined_call_operand.vmem [shape: bf16[128,128], index: 4, kind: input, shape index: {}]   ;;  %s1484_s5 = inlined_call_operand.hbm [shape: f32[1,128], index: 5, kind: input, shape index: {}]   ;;  %s1485_s6 = inlined_call_operand.vmem [shape: bf16[128,16], index: 6, kind: input, shape index: {}]   ;;  %s1486_s7 = inlined_call_operand.hbm [shape: f32[1,16], index: 7, kind: input, shape index: {}]   ;;  %s1487_s8 = inlined_call_operand.vmem [shape: bf16[24,128], index: 8, kind: input, shape index: {}]   ;;  %s1488_s9 = inlined_call_operand.vmem [shape: bf16[8,128], index: 9, kind: input, shape index: {}]   ;;  %s1489_s10 = inlined_call_operand.vmem [shape: f32[1,128], index: 10, kind: input, shape index: {}]   ;;  %s1490_s11 = inlined_call_operand.vmem [shape: bf16[128,128], index: 11, kind: input, shape index: {}]   ;;  %s1491_s12 = inlined_call_operand.vmem [shape: f32[1,128], index: 12, kind: input, shape index: {}]   ;;  %s1492_s13 = inlined_call_operand.vmem [shape: bf16[128,4], index: 13, kind: input, shape index: {}]   ;;  %s1493_s14 = inlined_call_operand.vmem [shape: f32[1,4], index: 14, kind: input, shape index: {}]   ;;  %s1494_s15 = inlined_call_operand.hbm [shape: f32[8,20], index: 15, kind: output, shape index: {}]  }
   0x1   :  { %22 = vsyncpa [#allocation7], 0 }
   0x2   :  { %23 = vsyncpa [#allocation10], 0 }
   0x3   :  { %24 = vsyncpa [#allocation5], 0  ;;  %s1140_s18 = smov [#allocation6]   ;;  %s1141_s20 = smov [#allocation3]  }
   0x4   :  { %s45_s19 = sshll.u32 %s1140_s18, 4  ;;  %s33_s21 = sshll.u32 %s1141_s20, 4  ;;  %s46_s19 = int_to_ptr.vmem [resolvable:$true] %s45_s19  ;;  %s34_s21 = int_to_ptr.vmem [resolvable:$true] %s33_s21 }
   0x5   :  { %s1022_s24 = scalar_lea.hbm %s1482_s3, 16 }
   0x6   :  { %p1023_p0 = scmp.ne.s32.totalorder %s1482_s3, %s1022_s24  ;;  %p1026_p1 = scmp.lt.u32.totalorder %s1022_s24, %s1482_s3 }
   0x8   :  { %p1028_p2 = pnand %p1026_p1, %p1023_p0 }
   0xa   :  { %1031 = shalt.err (!%p1028_p2)
}
   0xb   :  { %s1032_s29 = scalar_lea.vmem %s46_s19, 16  ;;  %s1036_s30 = scalar_lea.vmem %s46_s19, 32 }
   0xc   :  { %p1033_p3 = scmp.ne.s32.totalorder %s46_s19, %s1032_s29  ;;  %p1037_p4 = scmp.lt.s32.totalorder %s46_s19, %s46_s19 }
   0xd   :  { %p1038_p5 = scmp.lt.s32.totalorder %s1036_s30, %s1032_s29 }
   0xf   :  { %p1039_p6 = por %p1038_p5, %p1037_p4 }
  0x11   :  { %p1040_p7 = pnand %p1039_p6, %p1033_p3 }
  0x13   :  { %1043 = shalt.err (!%p1040_p7)
}
  0x14   :  { %48 = dma.hbm_to_vmem [thread:$0]  %s1482_s3, 16, %s46_s19, [#allocation7]  }
  0x15   :  { %s1044_s22 = scalar_lea.hbm %s1480_s1, 128 }
  0x16   :  { %p1045_p8 = scmp.ne.s32.totalorder %s1480_s1, %s1044_s22  ;;  %p1048_p9 = scmp.lt.u32.totalorder %s1044_s22, %s1480_s1 }
  0x18   :  { %p1050_p10 = pnand %p1048_p9, %p1045_p8 }
  0x1a   :  { %1053 = shalt.err (!%p1050_p10)
}
  0x1b   :  { %s1054_s27 = scalar_lea.vmem %s34_s21, 128  ;;  %p1059_p12 = scmp.lt.s32.totalorder %s34_s21, %s34_s21 }
  0x1c   :  { %p1055_p11 = scmp.ne.s32.totalorder %s34_s21, %s1054_s27  ;;  %p1060_p13 = scmp.lt.s32.totalorder %s1054_s27, %s1054_s27 }
  0x1e   :  { %p1061_p0 = por %p1060_p13, %p1059_p12 }
  0x20   :  { %p1062_p1 = pnand %p1061_p0, %p1055_p11 }
  0x22   :  { %1065 = shalt.err (!%p1062_p1)
}
  0x23   :  { %36 = dma.hbm_to_vmem [thread:$0]  %s1480_s1, 128, %s34_s21, [#allocation4]  }
  0x24   :  { %s1142_s28 = smov [#allocation8]   ;;  %s1143_s30 = smov [#allocation9]  }
  0x25   :  { %s57_s29 = sshll.u32 %s1142_s28, 4  ;;  %s69_s16 = sshll.u32 %s1143_s30, 4  ;;  %s58_s29 = int_to_ptr.vmem [resolvable:$true] %s57_s29  ;;  %s70_s16 = int_to_ptr.vmem [resolvable:$true] %s69_s16 }
  0x26   :  { %s1066_s20 = scalar_lea.hbm %s1484_s5, 16 }
  0x27   :  { %p1067_p2 = scmp.ne.s32.totalorder %s1484_s5, %s1066_s20  ;;  %p1070_p3 = scmp.lt.u32.totalorder %s1066_s20, %s1484_s5 }
  0x29   :  { %p1072_p4 = pnand %p1070_p3, %p1067_p2 }
  0x2b   :  { %1075 = shalt.err (!%p1072_p4)
}
  0x2c   :  { %s1076_s1 = scalar_lea.vmem %s58_s29, 16  ;;  %s1080_s21 = scalar_lea.vmem %s58_s29, 32 }
  0x2d   :  { %p1077_p5 = scmp.ne.s32.totalorder %s58_s29, %s1076_s1  ;;  %p1081_p6 = scmp.lt.s32.totalorder %s58_s29, %s58_s29 }
  0x2e   :  { %p1082_p7 = scmp.lt.s32.totalorder %s1080_s21, %s1076_s1 }
  0x30   :  { %p1083_p8 = por %p1082_p7, %p1081_p6 }
  0x32   :  { %p1084_p9 = pnand %p1083_p8, %p1077_p5 }
  0x34   :  { %1087 = shalt.err (!%p1084_p9)
}
  0x35   :  { %60 = dma.hbm_to_vmem [thread:$0]  %s1484_s5, 16, %s58_s29, [#allocation7]  }
  0x36   :  { %s1088_s28 = scalar_lea.hbm %s1486_s7, 16 }
  0x37   :  { %p1089_p10 = scmp.ne.s32.totalorder %s1486_s7, %s1088_s28  ;;  %p1092_p11 = scmp.lt.u32.totalorder %s1088_s28, %s1486_s7 }
  0x39   :  { %p1094_p12 = pnand %p1092_p11, %p1089_p10 }
  0x3b   :  { %1097 = shalt.err (!%p1094_p12)
}
  0x3c   :  { %s1098_s22 = scalar_lea.vmem %s70_s16, 16  ;;  %s1102_s23 = scalar_lea.vmem %s70_s16, 32 }
  0x3d   :  { %p1099_p13 = scmp.ne.s32.totalorder %s70_s16, %s1098_s22  ;;  %p1103_p0 = scmp.lt.s32.totalorder %s70_s16, %s70_s16 }
  0x3e   :  { %p1104_p1 = scmp.lt.s32.totalorder %s1102_s23, %s1098_s22 }
  0x40   :  { %p1105_p2 = por %p1104_p1, %p1103_p0 }
  0x42   :  { %p1106_p3 = pnand %p1105_p2, %p1099_p13 }
  0x44   :  { %1109 = shalt.err (!%p1106_p3)
}
  0x45   :  { %72 = dma.hbm_to_vmem [thread:$0]  %s1486_s7, 16, %s70_s16, [#allocation10]  }
  0x46   :  { %1132 = dma.done.wait [#allocation4], 128  }
  0x47   :  { %1133 = vsyncadd [#allocation4], 4294967168 }
  0x48   :  { %1134 = dma.done.wait [#allocation7], 32  }
  0x49   :  { %1135 = vsyncadd [#allocation7], 4294967264 }
  0x4a   :  { %1136 = dma.done.wait [#allocation10], 16  }
  0x4b   :  { %1137 = vsyncadd [#allocation10], 4294967280  ;;  %v1144_v0 = vmov 0.0   ;;  %vm1145_vm0 = vmmov 0   ;;  %v982_v1 = vld [vmem:[%s1481_s2] sm:$0xff]   ;;  %vm126_vm1 = vcmask 1043456  }
  0x4c   :  { %871 = vmatprep.subr.bf16.mxu0 %v1144_v0  ;;  %875 = vmatprep.mubr.msk.bf16.mxu0 %vm1145_vm0, %v1144_v0  ;;  %v983_v2 = vld [vmem:[%s1481_s2 + $0x8] ss:$0 sps:$4 sm:$0xff]   ;;  %v1289_v3 = vld [vmem:[#allocation3] sm:$0xff]  ;;  %vm122_vm2 = vcmask 195584   ;;  %v986_v8 = vld [vmem:[%s1483_s4 + $0x10] sm:$0xff]   ;;  %s1146_s20 = smov 120  }
  0x4d   :  { %879 = vmatprep.subr.bf16.mxu1 %v1144_v0  ;;  %895 = vmatprep.mubr.msk.bf16.mxu1 %vm1145_vm0, %v1144_v0  ;;  %v984_v4 = vld [vmem:[%s1483_s4] sm:$0xff]   ;;  %v128_v5 = vsel %vm126_vm1, %v983_v2, 0  ;;  %v985_v6 = vld [vmem:[%s1483_s4 + $0x8] sm:$0xff]   ;;  %v1301_v7 = vpack.c.bf16 %v1289_v3, %v1289_v3  ;;  %v987_v9 = vld [vmem:[%s1483_s4 + $0x18] sm:$0xff]   ;;  %s1147_s29 = smov 4   ;;  %vm415_vm3 = vcmask 64512  }
  0x4e   :  { %872 = vmatpush3.bf16.msra.mxu0 %v982_v1  ;;  %880 = vmatpush3.bf16.msra.mxu1 %v984_v4  ;;  %v988_v10 = vld [vmem:[%s1483_s4 + $0x20] sm:$0xff]   ;;  %v989_v11 = vld [vmem:[%s1483_s4 + $0x28] sm:$0xff]   ;;  %v990_v12 = vld [vmem:[%s1483_s4 + $0x30] sm:$0xff]   ;;  %vm759_vm4 = vcmask 31744   ;;  %s1148_s28 = smov [#allocation11]   ;;  %vm761_vm5 = vcmask 97280  }
  0x4f   :  { %873 = vmatprep.subr.bf16.mxu0 %v1144_v0  ;;  %881 = vmatprep.subr.bf16.mxu1 %v1144_v0  ;;  %v991_v13 = vld [vmem:[%s1483_s4 + $0x38] sm:$0xff]   ;;  %v992_v14 = vld [vmem:[%s1485_s6] sm:$0xff]   ;;  %v993_v15 = vld [vmem:[%s1485_s6 + $0x8] sm:$0xff]   ;;  %s771_s30 = sshll.u32 %s1148_s28, 4  ;;  %vm763_vm6 = vcmask 162816   ;;  %s772_s30 = int_to_ptr.vmem [resolvable:$true] %s771_s30 }
  0x50   :  { %v994_v16 = vld [vmem:[%s1485_s6 + $0x10] sm:$0xff]   ;;  %v995_v17 = vld [vmem:[%s1485_s6 + $0x18] sm:$0xff]   ;;  %v996_v18 = vld [vmem:[%s1485_s6 + $0x20] sm:$0xff]   ;;  %401 = vrot.lane.b32.xlu0 %v1289_v3, %s1146_s20  ;;  %p1115_p5 = scmp.lt.s32.totalorder %s772_s30, %s772_s30 }
  0x51   :  { %v997_v19 = vld [vmem:[%s1485_s6 + $0x28] sm:$0xff]   ;;  %v998_v28 = vld [vmem:[%s1485_s6 + $0x30] sm:$0xff]   ;;  %v999_v29 = vld [vmem:[%s1485_s6 + $0x38] sm:$0xff]  }
  0x52   :  { %874 = vmatpush3.bf16.msra.mxu0 %v128_v5  ;;  %882 = vmatpush3.bf16.msra.mxu1 %v985_v6  ;;  %v782_v20 = vld [vmem:[#allocation6] ss:$0 sm:$0xff]  ;;  %v786_v30 = vld [vmem:[#allocation8] ss:$0 sm:$0xff]  ;;  %v1000_v38 = vld [vmem:[%s1487_s8] sm:$0xff]  }
  0x53   :  { %899 = vmatprep.subr.bf16.mxu0 %v1144_v0  ;;  %883 = vmatprep.subr.bf16.mxu1 %v1144_v0  ;;  %v414_v39 = vld [vmem:[%s1488_s9] sm:$0xf]  ;;  %v795_v41 = vld [vmem:[#allocation9] ss:$0 sm:$0xff]  ;;  %v1001_v48 = vld [vmem:[%s1487_s8 + $0x8] ss:$0 sps:$4 sm:$0xff]  }
  0x54   :  { %v420_v40 = vsel %vm126_vm1, %v414_v39, 0  ;;  %v472_v50 = vsel %vm126_vm1, %v1001_v48, 0  ;;  %v1002_v57 = vld [vmem:[%s1490_s11] sm:$0xff]   ;;  %v1003_v59 = vld [vmem:[%s1490_s11 + $0x8] sm:$0xff]   ;;  %v1004_v60 = vld [vmem:[%s1490_s11 + $0x10] sm:$0xff]  }
  0x55   :  { %876 = vmatmul.mubr.msk.bf16.vlgmr.msra.gmra.mrb[0].mxu0 %vm122_vm2, %v1301_v7  ;;  %v1005_v61 = vld [vmem:[%s1490_s11 + $0x18] sm:$0xff]   ;;  %v1006_v62 = vld [vmem:[%s1490_s11 + $0x20] sm:$0xff]   ;;  %v1007_v63 = vld [vmem:[%s1490_s11 + $0x28] sm:$0xff]  }
  0x56   :  { %915 = vmatprep.mubr.msk.bf16.mxu0 %vm1145_vm0, %v1144_v0  ;;  %884 = vmatpush3.bf16.msra.mxu1 %v986_v8  ;;  %v1008_v5 = vld [vmem:[%s1490_s11 + $0x30] sm:$0xff]   ;;  %v1009_v6 = vld [vmem:[%s1490_s11 + $0x38] sm:$0xff]   ;;  %v1011_v8 = vld [vmem:[%s1492_s13 + $0x8] sm:$0xff]  }
  0x57   :  { %885 = vmatprep.subr.bf16.mxu1 %v1144_v0  ;;  %900 = vmatpush3.bf16.msra.mxu0 %v992_v14  ;;  %v808_v14 = vld [vmem:[%s1489_s10] ss:$0 sm:$0xff] }
  0x58   :  { %901 = vmatprep.subr.bf16.mxu0 %v1144_v0 }
  0x5a   :  { %886 = vmatpush3.bf16.msra.mxu1 %v987_v9  ;;  %v1012_v9 = vld [vmem:[%s1492_s13 + $0x10] sm:$0xff]  }
  0x5b   :  { %887 = vmatprep.subr.bf16.mxu1 %v1144_v0  ;;  %902 = vmatpush3.bf16.msra.mxu0 %v993_v15 }
  0x5c   :  { %903 = vmatprep.subr.bf16.mxu0 %v1144_v0 }
  0x5e   :  { %888 = vmatpush3.bf16.msra.mxu1 %v988_v10  ;;  %v1013_v10 = vld [vmem:[%s1492_s13 + $0x18] sm:$0xff]  }
  0x5f   :  { %889 = vmatprep.subr.bf16.mxu1 %v1144_v0  ;;  %904 = vmatpush3.bf16.msra.mxu0 %v994_v16 }
  0x60   :  { %905 = vmatprep.subr.bf16.mxu0 %v1144_v0 }
  0x62   :  { %890 = vmatpush3.bf16.msra.mxu1 %v989_v11  ;;  %v1014_v11 = vld [vmem:[%s1492_s13 + $0x20] sm:$0xff]  }
  0x63   :  { %891 = vmatprep.subr.bf16.mxu1 %v1144_v0  ;;  %906 = vmatpush3.bf16.msra.mxu0 %v995_v17 }
  0x64   :  { %907 = vmatprep.subr.bf16.mxu0 %v1144_v0 }
  0x66   :  { %892 = vmatpush3.bf16.msra.mxu1 %v990_v12  ;;  %v1015_v12 = vld [vmem:[%s1492_s13 + $0x28] sm:$0xff]  }
  0x67   :  { %893 = vmatprep.subr.bf16.mxu1 %v1144_v0  ;;  %908 = vmatpush3.bf16.msra.mxu0 %v996_v18 }
  0x68   :  { %909 = vmatprep.subr.bf16.mxu0 %v1144_v0 }
  0x6a   :  { %894 = vmatpush3.bf16.msra.mxu1 %v991_v13 }
  0x6b   :  { %919 = vmatprep.subr.bf16.mxu1 %v1144_v0  ;;  %910 = vmatpush3.bf16.msra.mxu0 %v997_v19 }
  0x6c   :  { %911 = vmatprep.subr.bf16.mxu0 %v1144_v0 }
  0x6f   :  { %912 = vmatpush3.bf16.msra.mxu0 %v998_v28 }
  0x70   :  { %913 = vmatprep.subr.bf16.mxu0 %v1144_v0 }
  0x73   :  { %914 = vmatpush3.bf16.msra.mxu0 %v999_v29 }
  0x74   :  { %925 = vmatprep.subr.bf16.mxu0 %v1144_v0 }
  0xc2   :  { %v402_v52 = vpop.permute.xlu0 %401 }
 0x128   :  { %v164_v21 = vpop.f32.mrb[0].mxu0 }
 0x129   :  { %v165_v22 = vadd.f32 %v782_v20, %v164_v21  ;;  %v877_v23 = vpop.f32.mrb[1].mxu0 }
 0x12a   :  { %v167_v24 = vpop.f32.mrb[2].mxu0  ;;  %v1017_v23 = vld [vmem:[%s1492_s13 + $0x38] sm:$0xff]  }
 0x12b   :  { %v170_v25 = vmax.f32 %v165_v22, 0.0  ;;  %v878_v26 = vpop.f32.mrb[3].mxu0  ;;  %v1016_v22 = vld [vmem:[%s1492_s13 + $0x30] sm:$0xff]   ;;  %v809_v24 = vld [vmem:[%s1491_s12] ss:$0 sm:$0xff] }
 0x12d   :  { %v171_v27 = vpack.c.bf16 %v170_v25, %v170_v25 }
 0x12f   :  { %896 = vmatmul.mubr.bf16.vlgmr.msra.gmra.mrb[0].mxu1 %v171_v27 }
 0x130   :  { %921 = vmatprep.mubr.msk.bf16.mxu1 %vm1145_vm0, %v1144_v0  ;;  %920 = vmatpush3.bf16.msra.mxu1 %v420_v40 }
 0x131   :  { %933 = vmatprep.subr.bf16.mxu1 %v1144_v0 }
 0x202   :  { %v277_v31 = vpop.f32.mrb[0].mxu1 }
 0x203   :  { %v278_v32 = vadd.f32 %v786_v30, %v277_v31  ;;  %v897_v33 = vpop.f32.mrb[1].mxu1 }
 0x204   :  { %v280_v34 = vpop.f32.mrb[2].mxu1 }
 0x205   :  { %v283_v35 = vmax.f32 %v278_v32, 0.0  ;;  %v898_v36 = vpop.f32.mrb[3].mxu1 }
 0x207   :  { %v284_v37 = vpack.c.bf16 %v283_v35, %v283_v35 }
 0x209   :  { %916 = vmatmul.mubr.bf16.vlgmr.msra.gmra.mrb[4].mxu0 %v284_v37  ;;  %v749_v37 = vstv %s1479_s0 }
 0x20a   :  { %929 = vmatprep.mubr.msk.bf16.mxu0 %vm1145_vm0, %v1144_v0  ;;  %926 = vmatpush3.bf16.msra.mxu0 %v1000_v38 }
 0x20b   :  { %927 = vmatprep.subr.bf16.mxu0 %v1144_v0 }
 0x20e   :  { %928 = vmatpush3.bf16.msra.mxu0 %v472_v50 }
 0x20f   :  { %953 = vmatprep.subr.bf16.mxu0 %v1144_v0 }
 0x211   :  { %930 = vmatmul.mubr.msk.bf16.vlgmr.msra.gmra.mrb[8].mxu0 %vm122_vm2, %v1301_v7  ;;  %v1010_v7 = vld [vmem:[%s1492_s13] sm:$0xff]  }
 0x212   :  { %969 = vmatprep.mubr.msk.bf16.mxu0 %vm1145_vm0, %v1144_v0  ;;  %954 = vmatpush3.bf16.msra.mxu0 %v1010_v7 }
 0x213   :  { %955 = vmatprep.subr.bf16.mxu0 %v1144_v0 }
 0x216   :  { %956 = vmatpush3.bf16.msra.mxu0 %v1011_v8 }
 0x217   :  { %957 = vmatprep.subr.bf16.mxu0 %v1144_v0 }
 0x21a   :  { %958 = vmatpush3.bf16.msra.mxu0 %v1012_v9 }
 0x21b   :  { %959 = vmatprep.subr.bf16.mxu0 %v1144_v0 }
 0x21e   :  { %960 = vmatpush3.bf16.msra.mxu0 %v1013_v10 }
 0x21f   :  { %961 = vmatprep.subr.bf16.mxu0 %v1144_v0 }
 0x222   :  { %962 = vmatpush3.bf16.msra.mxu0 %v1014_v11 }
 0x223   :  { %963 = vmatprep.subr.bf16.mxu0 %v1144_v0 }
 0x226   :  { %964 = vmatpush3.bf16.msra.mxu0 %v1015_v12 }
 0x227   :  { %965 = vmatprep.subr.bf16.mxu0 %v1144_v0 }
 0x22a   :  { %966 = vmatpush3.bf16.msra.mxu0 %v1016_v22 }
 0x22b   :  { %967 = vmatprep.subr.bf16.mxu0 %v1144_v0 }
 0x22e   :  { %968 = vmatpush3.bf16.msra.mxu0 %v1017_v23 }
 0x2dc   :  { %v390_v42 = vpop.f32.mrb[4].mxu0 }
 0x2dd   :  { %v391_v43 = vadd.f32 %v795_v41, %v390_v42  ;;  %v917_v44 = vpop.f32.mrb[5].mxu0 }
 0x2de   :  { %v393_v45 = vpop.f32.mrb[6].mxu0 }
 0x2df   :  { %v396_v46 = vmax.f32 %v391_v43, -4.0  ;;  %752 = vrot.lane.b32.xlu1 %v391_v43, %s1147_s29  ;;  %v918_v47 = vpop.f32.mrb[7].mxu0 }
 0x2e1   :  { %v397_v49 = vmin.f32 %v396_v46, 15.0 }
 0x2e3   :  { %v398_v51 = vmul.f32 1.442695, %v397_v49 }
 0x2e4   :  { %v508_v1 = vpop.f32.mrb[8].mxu0 }
 0x2e5   :  { %1018 = vpow2.f32 %v398_v51  ;;  %v931_v2 = vpop.f32.mrb[9].mxu0 }
 0x2e6   :  { %v511_v3 = vpop.f32.mrb[10].mxu0 }
 0x2e7   :  { %v932_v4 = vpop.f32.mrb[11].mxu0 }
 0x2ef   :  { %v1019_v53 = vpop.eup %1018 }
 0x2f0   :  { %v404_v54 = vmul.f32 %v1019_v53, %v402_v52  ;;  %756 = vrot.lane.b32.xlu1 %v1019_v53, %s1147_s29 }
 0x2f2   :  { %406 = vrot.lane.b32.xlu0 %v404_v54, %s1146_s20 }
 0x351   :  { %v753_v38 = vpop.permute.xlu1 %752 }
 0x362   :  { %v757_v41 = vpop.permute.xlu1 %756 }
 0x364   :  { %v407_v55 = vpop.permute.xlu0 %406 }
 0x365   :  { %v409_v56 = vadd.f32 %v407_v55, %v391_v43 }
 0x367   :  { %v413_v58 = vpack.c.bf16 %v409_v56, %v409_v56 }
 0x369   :  { %922 = vmatmul.mubr.msk.bf16.vlgmr.msra.gmra.mrb[4].mxu1 %vm415_vm3, %v413_v58 }
 0x36a   :  { %934 = vmatpush3.bf16.msra.mxu1 %v1002_v57  ;;  %949 = vmatprep.mubr.msk.bf16.mxu1 %vm1145_vm0, %v1144_v0 }
 0x36b   :  { %935 = vmatprep.subr.bf16.mxu1 %v1144_v0 }
 0x36e   :  { %936 = vmatpush3.bf16.msra.mxu1 %v1003_v59 }
 0x36f   :  { %937 = vmatprep.subr.bf16.mxu1 %v1144_v0 }
 0x372   :  { %938 = vmatpush3.bf16.msra.mxu1 %v1004_v60 }
 0x373   :  { %939 = vmatprep.subr.bf16.mxu1 %v1144_v0 }
 0x376   :  { %940 = vmatpush3.bf16.msra.mxu1 %v1005_v61 }
 0x377   :  { %941 = vmatprep.subr.bf16.mxu1 %v1144_v0 }
 0x37a   :  { %942 = vmatpush3.bf16.msra.mxu1 %v1006_v62 }
 0x37b   :  { %943 = vmatprep.subr.bf16.mxu1 %v1144_v0 }
 0x37e   :  { %944 = vmatpush3.bf16.msra.mxu1 %v1007_v63 }
 0x37f   :  { %945 = vmatprep.subr.bf16.mxu1 %v1144_v0 }
 0x382   :  { %946 = vmatpush3.bf16.msra.mxu1 %v1008_v5 }
 0x383   :  { %947 = vmatprep.subr.bf16.mxu1 %v1144_v0  ;;  %v818_v0 = vld [vmem:[%s1493_s14] ss:$0 sm:$0xff]  ;;  %s1110_s14 = scalar_lea.vmem %s772_s30, 128 }
 0x384   :  { %p1111_p4 = scmp.ne.s32.totalorder %s772_s30, %s1110_s14  ;;  %p1116_p6 = scmp.lt.s32.totalorder %s1110_s14, %s1110_s14 }
 0x386   :  { %948 = vmatpush3.bf16.msra.mxu1 %v1009_v6  ;;  %p1117_p7 = por %p1116_p6, %p1115_p5 }
 0x388   :  { %p1118_p8 = pnand %p1117_p7, %p1111_p4 }
 0x43c   :  { %v456_v13 = vpop.f32.mrb[4].mxu1 }
 0x43d   :  { %v509_v15 = vadd.f32 %v508_v1, %v456_v13  ;;  %v923_v16 = vpop.f32.mrb[5].mxu1 }
 0x43e   :  { %v459_v17 = vpop.f32.mrb[6].mxu1 }
 0x43f   :  { %v521_v18 = vadd.f32 %v808_v14, %v509_v15  ;;  %v924_v19 = vpop.f32.mrb[7].mxu1 }
 0x441   :  { %v522_v20 = vmax.f32 %v521_v18, 0.0 }
 0x443   :  { %v523_v21 = vpack.c.bf16 %v522_v20, %v522_v20 }
 0x445   :  { %950 = vmatmul.mubr.bf16.vlgmr.msra.gmra.mrb[8].mxu1 %v523_v21 }
 0x518   :  { %v629_v25 = vpop.f32.mrb[8].mxu1 }
 0x519   :  { %v630_v26 = vadd.f32 %v809_v24, %v629_v25  ;;  %v951_v27 = vpop.f32.mrb[9].mxu1 }
 0x51a   :  { %v632_v28 = vpop.f32.mrb[10].mxu1 }
 0x51b   :  { %v635_v29 = vmax.f32 %v630_v26, 0.0  ;;  %v952_v30 = vpop.f32.mrb[11].mxu1 }
 0x51d   :  { %v636_v31 = vpack.c.bf16 %v635_v29, %v635_v29 }
 0x51f   :  { %970 = vmatmul.mubr.bf16.vlgmr.msra.gmra.mrb[12].mxu0 %v636_v31 }
 0x5f2   :  { %v742_v32 = vpop.f32.mrb[12].mxu0 }
 0x5f3   :  { %v743_v33 = vadd.f32 %v818_v0, %v742_v32  ;;  %v971_v34 = vpop.f32.mrb[13].mxu0 }
 0x5f4   :  { %v745_v35 = vpop.f32.mrb[14].mxu0 }
 0x5f5   :  { %1020 = vtanh.f32 %v743_v33  ;;  %v972_v36 = vpop.f32.mrb[15].mxu0 }
 0x5ff   :  { %v1021_v39 = vpop.eup %1020 }
 0x600   :  { %v750_v40 = vmul.f32 %v1021_v39, %v749_v37 }
 0x602   :  { %v760_v42 = vsel %vm759_vm4, %v750_v40, %v753_v38 }
 0x603   :  { %v762_v43 = vsel %vm761_vm5, %v760_v42, %v757_v41 }
 0x604   :  { %764 = vst.msk [vmem:[#allocation11] sm:$0xff] %vm763_vm6, %v762_v43 }
 0x605   :  { %1121 = shalt.err (!%p1118_p8)
}
 0x606   :  { %s1122_s18 = scalar_lea.hbm %s1494_s15, 128 }
 0x607   :  { %p1123_p9 = scmp.ne.s32.totalorder %s1494_s15, %s1122_s18  ;;  %p1126_p10 = scmp.lt.u32.totalorder %s1122_s18, %s1494_s15 }
 0x609   :  { %p1128_p11 = pnand %p1126_p10, %p1123_p9 }
 0x60b   :  { %1131 = shalt.err (!%p1128_p11)
}
 0x60c   :  { %774 = dma.vmem_to_hbm [thread:$0]  %s772_s30, 128, %s1494_s15, [#allocation5]  }
 0x60d   :  { %1138 = dma.done.wait [#allocation5], 128  }
 0x60e   :  { %1139 = vsyncadd [#allocation5], 4294967168 }
 0x60f   :  { %778 = vsyncpa [#allocation4], 1 }
 0x610   :  { %779 = vsyncpa [#allocation7], 1 }
 0x611   :  { %780 = vsyncpa [#allocation10], 1 }
 0x612   :  { %781 = vsyncpa [#allocation5], 1 }

// kernel: tpu_custom_call.1
= control target key start
LH: loop header
LB: loop body
LE: loop exit
PB: predicated region body
PF: predicated region fallthrough
CT: control target
= control target key end

     0   :  { %21 = vsyncpa [#allocation4], 0  ;;  %s1479_s0 = inlined_call_operand.<no memory space> [shape: f32[1], index: 0, kind: input, shape index: {}]   ;;  %s1480_s1 = inlined_call_operand.hbm [shape: f32[8,24], index: 1, kind: input, shape index: {}]   ;;  %s1481_s2 = inlined_call_operand.vmem [shape: bf16[24,128], index: 2, kind: input, shape index: {}]   ;;  %s1482_s3 = inlined_call_operand.hbm [shape: f32[1,128], index: 3, kind: input, shape index: {}]   ;;  %s1483_s4 = inlined_call_operand.vmem [shape: bf16[128,128], index: 4, kind: input, shape index: {}]   ;;  %s1484_s5 = inlined_call_operand.hbm [shape: f32[1,128], index: 5, kind: input, shape index: {}]   ;;  %s1485_s6 = inlined_call_operand.vmem [shape: bf16[128,16], index: 6, kind: input, shape index: {}]   ;;  %s1486_s7 = inlined_call_operand.hbm [shape: f32[1,16], index: 7, kind: input, shape index: {}]   ;;  %s1487_s8 = inlined_call_operand.vmem [shape: bf16[24,128], index: 8, kind: input, shape index: {}]   ;;  %s1488_s9 = inlined_call_operand.vmem [shape: bf16[8,128], index: 9, kind: input, shape index: {}]   ;;  %s1489_s10 = inlined_call_operand.vmem [shape: f32[1,128], index: 10, kind: input, shape index: {}]   ;;  %s1490_s11 = inlined_call_operand.vmem [shape: bf16[128,128], index: 11, kind: input, shape index: {}]   ;;  %s1491_s12 = inlined_call_operand.vmem [shape: f32[1,128], index: 12, kind: input, shape index: {}]   ;;  %s1492_s13 = inlined_call_operand.vmem [shape: bf16[128,4], index: 13, kind: input, shape index: {}]   ;;  %s1493_s14 = inlined_call_operand.vmem [shape: f32[1,4], index: 14, kind: input, shape index: {}]   ;;  %s1494_s15 = inlined_call_operand.hbm [shape: f32[8,20], index: 15, kind: output, shape index: {}]  }
   0x1   :  { %22 = vsyncpa [#allocation7], 0 }
   0x2   :  { %23 = vsyncpa [#allocation10], 0 }
   0x3   :  { %24 = vsyncpa [#allocation5], 0  ;;  %s1140_s18 = smov [#allocation6]   ;;  %s1141_s20 = smov [#allocation3]  }
   0x4   :  { %s45_s19 = sshll.u32 %s1140_s18, 4  ;;  %s33_s21 = sshll.u32 %s1141_s20, 4  ;;  %s46_s19 = int_to_ptr.vmem [resolvable:$true] %s45_s19  ;;  %s34_s21 = int_to_ptr.vmem [resolvable:$true] %s33_s21 }
   0x5   :  { %s1022_s24 = scalar_lea.hbm %s1482_s3, 16 }
   0x6   :  { %p1023_p0 = scmp.ne.s32.totalorder %s1482_s3, %s1022_s24  ;;  %p1026_p1 = scmp.lt.u32.totalorder %s1022_s24, %s1482_s3 }
   0x8   :  { %p1028_p2 = pnand %p1026_p1, %p1023_p0 }
   0xa   :  { %1031 = shalt.err (!%p1028_p2)
}
   0xb   :  { %s1032_s29 = scalar_lea.vmem %s46_s19, 16  ;;  %s1036_s30 = scalar_lea.vmem %s46_s19, 32 }
   0xc   :  { %p1033_p3 = scmp.ne.s32.totalorder %s46_s19, %s1032_s29  ;;  %p1037_p4 = scmp.lt.s32.totalorder %s46_s19, %s46_s19 }
   0xd   :  { %p1038_p5 = scmp.lt.s32.totalorder %s1036_s30, %s1032_s29 }
   0xf   :  { %p1039_p6 = por %p1038_p5, %p1037_p4 }
  0x11   :  { %p1040_p7 = pnand %p1039_p6, %p1033_p3 }
  0x13   :  { %1043 = shalt.err (!%p1040_p7)
}
  0x14   :  { %48 = dma.hbm_to_vmem [thread:$0]  %s1482_s3, 16, %s46_s19, [#allocation7]  }
  0x15   :  { %s1044_s22 = scalar_lea.hbm %s1480_s1, 128 }
  0x16   :  { %p1045_p8 = scmp.ne.s32.totalorder %s1480_s1, %s1044_s22  ;;  %p1048_p9 = scmp.lt.u32.totalorder %s1044_s22, %s1480_s1 }
  0x18   :  { %p1050_p10 = pnand %p1048_p9, %p1045_p8 }
  0x1a   :  { %1053 = shalt.err (!%p1050_p10)
}
  0x1b   :  { %s1054_s27 = scalar_lea.vmem %s34_s21, 128  ;;  %p1059_p12 = scmp.lt.s32.totalorder %s34_s21, %s34_s21 }
  0x1c   :  { %p1055_p11 = scmp.ne.s32.totalorder %s34_s21, %s1054_s27  ;;  %p1060_p13 = scmp.lt.s32.totalorder %s1054_s27, %s1054_s27 }
  0x1e   :  { %p1061_p0 = por %p1060_p13, %p1059_p12 }
  0x20   :  { %p1062_p1 = pnand %p1061_p0, %p1055_p11 }
  0x22   :  { %1065 = shalt.err (!%p1062_p1)
}
  0x23   :  { %36 = dma.hbm_to_vmem [thread:$0]  %s1480_s1, 128, %s34_s21, [#allocation4]  }
  0x24   :  { %s1142_s28 = smov [#allocation8]   ;;  %s1143_s30 = smov [#allocation9]  }
  0x25   :  { %s57_s29 = sshll.u32 %s1142_s28, 4  ;;  %s69_s16 = sshll.u32 %s1143_s30, 4  ;;  %s58_s29 = int_to_ptr.vmem [resolvable:$true] %s57_s29  ;;  %s70_s16 = int_to_ptr.vmem [resolvable:$true] %s69_s16 }
  0x26   :  { %s1066_s20 = scalar_lea.hbm %s1484_s5, 16 }
  0x27   :  { %p1067_p2 = scmp.ne.s32.totalorder %s1484_s5, %s1066_s20  ;;  %p1070_p3 = scmp.lt.u32.totalorder %s1066_s20, %s1484_s5 }
  0x29   :  { %p1072_p4 = pnand %p1070_p3, %p1067_p2 }
  0x2b   :  { %1075 = shalt.err (!%p1072_p4)
}
  0x2c   :  { %s1076_s1 = scalar_lea.vmem %s58_s29, 16  ;;  %s1080_s21 = scalar_lea.vmem %s58_s29, 32 }
  0x2d   :  { %p1077_p5 = scmp.ne.s32.totalorder %s58_s29, %s1076_s1  ;;  %p1081_p6 = scmp.lt.s32.totalorder %s58_s29, %s58_s29 }
  0x2e   :  { %p1082_p7 = scmp.lt.s32.totalorder %s1080_s21, %s1076_s1 }
  0x30   :  { %p1083_p8 = por %p1082_p7, %p1081_p6 }
  0x32   :  { %p1084_p9 = pnand %p1083_p8, %p1077_p5 }
  0x34   :  { %1087 = shalt.err (!%p1084_p9)
}
  0x35   :  { %60 = dma.hbm_to_vmem [thread:$0]  %s1484_s5, 16, %s58_s29, [#allocation7]  }
  0x36   :  { %s1088_s28 = scalar_lea.hbm %s1486_s7, 16 }
  0x37   :  { %p1089_p10 = scmp.ne.s32.totalorder %s1486_s7, %s1088_s28  ;;  %p1092_p11 = scmp.lt.u32.totalorder %s1088_s28, %s1486_s7 }
  0x39   :  { %p1094_p12 = pnand %p1092_p11, %p1089_p10 }
  0x3b   :  { %1097 = shalt.err (!%p1094_p12)
}
  0x3c   :  { %s1098_s22 = scalar_lea.vmem %s70_s16, 16  ;;  %s1102_s23 = scalar_lea.vmem %s70_s16, 32 }
  0x3d   :  { %p1099_p13 = scmp.ne.s32.totalorder %s70_s16, %s1098_s22  ;;  %p1103_p0 = scmp.lt.s32.totalorder %s70_s16, %s70_s16 }
  0x3e   :  { %p1104_p1 = scmp.lt.s32.totalorder %s1102_s23, %s1098_s22 }
  0x40   :  { %p1105_p2 = por %p1104_p1, %p1103_p0 }
  0x42   :  { %p1106_p3 = pnand %p1105_p2, %p1099_p13 }
  0x44   :  { %1109 = shalt.err (!%p1106_p3)
}
  0x45   :  { %72 = dma.hbm_to_vmem [thread:$0]  %s1486_s7, 16, %s70_s16, [#allocation10]  }
  0x46   :  { %1132 = dma.done.wait [#allocation4], 128  }
  0x47   :  { %1133 = vsyncadd [#allocation4], 4294967168 }
  0x48   :  { %1134 = dma.done.wait [#allocation7], 32  }
  0x49   :  { %1135 = vsyncadd [#allocation7], 4294967264 }
  0x4a   :  { %1136 = dma.done.wait [#allocation10], 16  }
  0x4b   :  { %1137 = vsyncadd [#allocation10], 4294967280  ;;  %v1144_v0 = vmov 0.0   ;;  %vm1145_vm0 = vmmov 0   ;;  %v982_v1 = vld [vmem:[%s1481_s2] sm:$0xff]   ;;  %vm126_vm1 = vcmask 1043456  }
  0x4c   :  { %871 = vmatprep.subr.bf16.mxu0 %v1144_v0  ;;  %875 = vmatprep.mubr.msk.bf16.mxu0 %vm1145_vm0, %v1144_v0  ;;  %v983_v2 = vld [vmem:[%s1481_s2 + $0x8] ss:$0 sps:$4 sm:$0xff]   ;;  %v1289_v3 = vld [vmem:[#allocation3] sm:$0xff]  ;;  %vm122_vm2 = vcmask 195584   ;;  %v986_v8 = vld [vmem:[%s1483_s4 + $0x10] sm:$0xff]   ;;  %s1146_s20 = smov 120  }
  0x4d   :  { %879 = vmatprep.subr.bf16.mxu1 %v1144_v0  ;;  %895 = vmatprep.mubr.msk.bf16.mxu1 %vm1145_vm0, %v1144_v0  ;;  %v984_v4 = vld [vmem:[%s1483_s4] sm:$0xff]   ;;  %v128_v5 = vsel %vm126_vm1, %v983_v2, 0  ;;  %v985_v6 = vld [vmem:[%s1483_s4 + $0x8] sm:$0xff]   ;;  %v1301_v7 = vpack.c.bf16 %v1289_v3, %v1289_v3  ;;  %v987_v9 = vld [vmem:[%s1483_s4 + $0x18] sm:$0xff]   ;;  %s1147_s29 = smov 4   ;;  %vm415_vm3 = vcmask 64512  }
  0x4e   :  { %872 = vmatpush3.bf16.msra.mxu0 %v982_v1  ;;  %880 = vmatpush3.bf16.msra.mxu1 %v984_v4  ;;  %v988_v10 = vld [vmem:[%s1483_s4 + $0x20] sm:$0xff]   ;;  %v989_v11 = vld [vmem:[%s1483_s4 + $0x28] sm:$0xff]   ;;  %v990_v12 = vld [vmem:[%s1483_s4 + $0x30] sm:$0xff]   ;;  %vm759_vm4 = vcmask 31744   ;;  %s1148_s28 = smov [#allocation11]   ;;  %vm761_vm5 = vcmask 97280  }
  0x4f   :  { %873 = vmatprep.subr.bf16.mxu0 %v1144_v0  ;;  %881 = vmatprep.subr.bf16.mxu1 %v1144_v0  ;;  %v991_v13 = vld [vmem:[%s1483_s4 + $0x38] sm:$0xff]   ;;  %v992_v14 = vld [vmem:[%s1485_s6] sm:$0xff]   ;;  %v993_v15 = vld [vmem:[%s1485_s6 + $0x8] sm:$0xff]   ;;  %s771_s30 = sshll.u32 %s1148_s28, 4  ;;  %vm763_vm6 = vcmask 162816   ;;  %s772_s30 = int_to_ptr.vmem [resolvable:$true] %s771_s30 }
  0x50   :  { %v994_v16 = vld [vmem:[%s1485_s6 + $0x10] sm:$0xff]   ;;  %v995_v17 = vld [vmem:[%s1485_s6 + $0x18] sm:$0xff]   ;;  %v996_v18 = vld [vmem:[%s1485_s6 + $0x20] sm:$0xff]   ;;  %401 = vrot.lane.b32.xlu0 %v1289_v3, %s1146_s20  ;;  %p1115_p5 = scmp.lt.s32.totalorder %s772_s30, %s772_s30 }
  0x51   :  { %v997_v19 = vld [vmem:[%s1485_s6 + $0x28] sm:$0xff]   ;;  %v998_v28 = vld [vmem:[%s1485_s6 + $0x30] sm:$0xff]   ;;  %v999_v29 = vld [vmem:[%s1485_s6 + $0x38] sm:$0xff]  }
  0x52   :  { %874 = vmatpush3.bf16.msra.mxu0 %v128_v5  ;;  %882 = vmatpush3.bf16.msra.mxu1 %v985_v6  ;;  %v782_v20 = vld [vmem:[#allocation6] ss:$0 sm:$0xff]  ;;  %v786_v30 = vld [vmem:[#allocation8] ss:$0 sm:$0xff]  ;;  %v1000_v38 = vld [vmem:[%s1487_s8] sm:$0xff]  }
  0x53   :  { %899 = vmatprep.subr.bf16.mxu0 %v1144_v0  ;;  %883 = vmatprep.subr.bf16.mxu1 %v1144_v0  ;;  %v414_v39 = vld [vmem:[%s1488_s9] sm:$0xf]  ;;  %v795_v41 = vld [vmem:[#allocation9] ss:$0 sm:$0xff]  ;;  %v1001_v48 = vld [vmem:[%s1487_s8 + $0x8] ss:$0 sps:$4 sm:$0xff]  }
  0x54   :  { %v420_v40 = vsel %vm126_vm1, %v414_v39, 0  ;;  %v472_v50 = vsel %vm126_vm1, %v1001_v48, 0  ;;  %v1002_v57 = vld [vmem:[%s1490_s11] sm:$0xff]   ;;  %v1003_v59 = vld [vmem:[%s1490_s11 + $0x8] sm:$0xff]   ;;  %v1004_v60 = vld [vmem:[%s1490_s11 + $0x10] sm:$0xff]  }
  0x55   :  { %876 = vmatmul.mubr.msk.bf16.vlgmr.msra.gmra.mrb[0].mxu0 %vm122_vm2, %v1301_v7  ;;  %v1005_v61 = vld [vmem:[%s1490_s11 + $0x18] sm:$0xff]   ;;  %v1006_v62 = vld [vmem:[%s1490_s11 + $0x20] sm:$0xff]   ;;  %v1007_v63 = vld [vmem:[%s1490_s11 + $0x28] sm:$0xff]  }
  0x56   :  { %915 = vmatprep.mubr.msk.bf16.mxu0 %vm1145_vm0, %v1144_v0  ;;  %884 = vmatpush3.bf16.msra.mxu1 %v986_v8  ;;  %v1008_v5 = vld [vmem:[%s1490_s11 + $0x30] sm:$0xff]   ;;  %v1009_v6 = vld [vmem:[%s1490_s11 + $0x38] sm:$0xff]   ;;  %v1011_v8 = vld [vmem:[%s1492_s13 + $0x8] sm:$0xff]  }
  0x57   :  { %885 = vmatprep.subr.bf16.mxu1 %v1144_v0  ;;  %900 = vmatpush3.bf16.msra.mxu0 %v992_v14  ;;  %v808_v14 = vld [vmem:[%s1489_s10] ss:$0 sm:$0xff] }
  0x58   :  { %901 = vmatprep.subr.bf16.mxu0 %v1144_v0 }
  0x5a   :  { %886 = vmatpush3.bf16.msra.mxu1 %v987_v9  ;;  %v1012_v9 = vld [vmem:[%s1492_s13 + $0x10] sm:$0xff]  }
  0x5b   :  { %887 = vmatprep.subr.bf16.mxu1 %v1144_v0  ;;  %902 = vmatpush3.bf16.msra.mxu0 %v993_v15 }
  0x5c   :  { %903 = vmatprep.subr.bf16.mxu0 %v1144_v0 }
  0x5e   :  { %888 = vmatpush3.bf16.msra.mxu1 %v988_v10  ;;  %v1013_v10 = vld [vmem:[%s1492_s13 + $0x18] sm:$0xff]  }
  0x5f   :  { %889 = vmatprep.subr.bf16.mxu1 %v1144_v0  ;;  %904 = vmatpush3.bf16.msra.mxu0 %v994_v16 }
  0x60   :  { %905 = vmatprep.subr.bf16.mxu0 %v1144_v0 }
  0x62   :  { %890 = vmatpush3.bf16.msra.mxu1 %v989_v11  ;;  %v1014_v11 = vld [vmem:[%s1492_s13 + $0x20] sm:$0xff]  }
  0x63   :  { %891 = vmatprep.subr.bf16.mxu1 %v1144_v0  ;;  %906 = vmatpush3.bf16.msra.mxu0 %v995_v17 }
  0x64   :  { %907 = vmatprep.subr.bf16.mxu0 %v1144_v0 }
  0x66   :  { %892 = vmatpush3.bf16.msra.mxu1 %v990_v12  ;;  %v1015_v12 = vld [vmem:[%s1492_s13 + $0x28] sm:$0xff]  }
  0x67   :  { %893 = vmatprep.subr.bf16.mxu1 %v1144_v0  ;;  %908 = vmatpush3.bf16.msra.mxu0 %v996_v18 }
  0x68   :  { %909 = vmatprep.subr.bf16.mxu0 %v1144_v0 }
  0x6a   :  { %894 = vmatpush3.bf16.msra.mxu1 %v991_v13 }
  0x6b   :  { %919 = vmatprep.subr.bf16.mxu1 %v1144_v0  ;;  %910 = vmatpush3.bf16.msra.mxu0 %v997_v19 }
  0x6c   :  { %911 = vmatprep.subr.bf16.mxu0 %v1144_v0 }
  0x6f   :  { %912 = vmatpush3.bf16.msra.mxu0 %v998_v28 }
  0x70   :  { %913 = vmatprep.subr.bf16.mxu0 %v1144_v0 }
  0x73   :  { %914 = vmatpush3.bf16.msra.mxu0 %v999_v29 }
  0x74   :  { %925 = vmatprep.subr.bf16.mxu0 %v1144_v0 }
  0xc2   :  { %v402_v52 = vpop.permute.xlu0 %401 }
 0x128   :  { %v164_v21 = vpop.f32.mrb[0].mxu0 }
 0x129   :  { %v165_v22 = vadd.f32 %v782_v20, %v164_v21  ;;  %v877_v23 = vpop.f32.mrb[1].mxu0 }
 0x12a   :  { %v167_v24 = vpop.f32.mrb[2].mxu0  ;;  %v1017_v23 = vld [vmem:[%s1492_s13 + $0x38] sm:$0xff]  }
 0x12b   :  { %v170_v25 = vmax.f32 %v165_v22, 0.0  ;;  %v878_v26 = vpop.f32.mrb[3].mxu0  ;;  %v1016_v22 = vld [vmem:[%s1492_s13 + $0x30] sm:$0xff]   ;;  %v809_v24 = vld [vmem:[%s1491_s12] ss:$0 sm:$0xff] }
 0x12d   :  { %v171_v27 = vpack.c.bf16 %v170_v25, %v170_v25 }
 0x12f   :  { %896 = vmatmul.mubr.bf16.vlgmr.msra.gmra.mrb[0].mxu1 %v171_v27 }
 0x130   :  { %921 = vmatprep.mubr.msk.bf16.mxu1 %vm1145_vm0, %v1144_v0  ;;  %920 = vmatpush3.bf16.msra.mxu1 %v420_v40 }
 0x131   :  { %933 = vmatprep.subr.bf16.mxu1 %v1144_v0 }
 0x202   :  { %v277_v31 = vpop.f32.mrb[0].mxu1 }
 0x203   :  { %v278_v32 = vadd.f32 %v786_v30, %v277_v31  ;;  %v897_v33 = vpop.f32.mrb[1].mxu1 }
 0x204   :  { %v280_v34 = vpop.f32.mrb[2].mxu1 }
 0x205   :  { %v283_v35 = vmax.f32 %v278_v32, 0.0  ;;  %v898_v36 = vpop.f32.mrb[3].mxu1 }
 0x207   :  { %v284_v37 = vpack.c.bf16 %v283_v35, %v283_v35 }
 0x209   :  { %916 = vmatmul.mubr.bf16.vlgmr.msra.gmra.mrb[4].mxu0 %v284_v37  ;;  %v749_v37 = vstv %s1479_s0 }
 0x20a   :  { %929 = vmatprep.mubr.msk.bf16.mxu0 %vm1145_vm0, %v1144_v0  ;;  %926 = vmatpush3.bf16.msra.mxu0 %v1000_v38 }
 0x20b   :  { %927 = vmatprep.subr.bf16.mxu0 %v1144_v0 }
 0x20e   :  { %928 = vmatpush3.bf16.msra.mxu0 %v472_v50 }
 0x20f   :  { %953 = vmatprep.subr.bf16.mxu0 %v1144_v0 }
 0x211   :  { %930 = vmatmul.mubr.msk.bf16.vlgmr.msra.gmra.mrb[8].mxu0 %vm122_vm2, %v1301_v7  ;;  %v1010_v7 = vld [vmem:[%s1492_s13] sm:$0xff]  }
 0x212   :  { %969 = vmatprep.mubr.msk.bf16.mxu0 %vm1145_vm0, %v1144_v0  ;;  %954 = vmatpush3.bf16.msra.mxu0 %v1010_v7 }
 0x213   :  { %955 = vmatprep.subr.bf16.mxu0 %v1144_v0 }
 0x216   :  { %956 = vmatpush3.bf16.msra.mxu0 %v1011_v8 }
 0x217   :  { %957 = vmatprep.subr.bf16.mxu0 %v1144_v0 }
 0x21a   :  { %958 = vmatpush3.bf16.msra.mxu0 %v1012_v9 }
 0x21b   :  { %959 = vmatprep.subr.bf16.mxu0 %v1144_v0 }
 0x21e   :  { %960 = vmatpush3.bf16.msra.mxu0 %v1013_v10 }
 0x21f   :  { %961 = vmatprep.subr.bf16.mxu0 %v1144_v0 }
 0x222   :  { %962 = vmatpush3.bf16.msra.mxu0 %v1014_v11 }
 0x223   :  { %963 = vmatprep.subr.bf16.mxu0 %v1144_v0 }
 0x226   :  { %964 = vmatpush3.bf16.msra.mxu0 %v1015_v12 }
 0x227   :  { %965 = vmatprep.subr.bf16.mxu0 %v1144_v0 }
 0x22a   :  { %966 = vmatpush3.bf16.msra.mxu0 %v1016_v22 }
 0x22b   :  { %967 = vmatprep.subr.bf16.mxu0 %v1144_v0 }
 0x22e   :  { %968 = vmatpush3.bf16.msra.mxu0 %v1017_v23 }
 0x2dc   :  { %v390_v42 = vpop.f32.mrb[4].mxu0 }
 0x2dd   :  { %v391_v43 = vadd.f32 %v795_v41, %v390_v42  ;;  %v917_v44 = vpop.f32.mrb[5].mxu0 }
 0x2de   :  { %v393_v45 = vpop.f32.mrb[6].mxu0 }
 0x2df   :  { %v396_v46 = vmax.f32 %v391_v43, -4.0  ;;  %752 = vrot.lane.b32.xlu1 %v391_v43, %s1147_s29  ;;  %v918_v47 = vpop.f32.mrb[7].mxu0 }
 0x2e1   :  { %v397_v49 = vmin.f32 %v396_v46, 15.0 }
 0x2e3   :  { %v398_v51 = vmul.f32 1.442695, %v397_v49 }
 0x2e4   :  { %v508_v1 = vpop.f32.mrb[8].mxu0 }
 0x2e5   :  { %1018 = vpow2.f32 %v398_v51  ;;  %v931_v2 = vpop.f32.mrb[9].mxu0 }
 0x2e6   :  { %v511_v3 = vpop.f32.mrb[10].mxu0 }
 0x2e7   :  { %v932_v4 = vpop.f32.mrb[11].mxu0 }
 0x2ef   :  { %v1019_v53 = vpop.eup %1018 }
 0x2f0   :  { %v404_v54 = vmul.f32 %v1019_v53, %v402_v52  ;;  %756 = vrot.lane.b32.xlu1 %v1019_v53, %s1147_s29 }
 0x2f2   :  { %406 = vrot.lane.b32.xlu0 %v404_v54, %s1146_s20 }
 0x351   :  { %v753_v38 = vpop.permute.xlu1 %752 }
 0x362   :  { %v757_v41 = vpop.permute.xlu1 %756 }
 0x364   :  { %v407_v55 = vpop.permute.xlu0 %406 }
 0x365   :  { %v409_v56 = vadd.f32 %v407_v55, %v391_v43 }
 0x367   :  { %v413_v58 = vpack.c.bf16 %v409_v56, %v409_v56 }
 0x369   :  { %922 = vmatmul.mubr.msk.bf16.vlgmr.msra.gmra.mrb[4].mxu1 %vm415_vm3, %v413_v58 }
 0x36a   :  { %934 = vmatpush3.bf16.msra.mxu1 %v1002_v57  ;;  %949 = vmatprep.mubr.msk.bf16.mxu1 %vm1145_vm0, %v1144_v0 }
 0x36b   :  { %935 = vmatprep.subr.bf16.mxu1 %v1144_v0 }
 0x36e   :  { %936 = vmatpush3.bf16.msra.mxu1 %v1003_v59 }
 0x36f   :  { %937 = vmatprep.subr.bf16.mxu1 %v1144_v0 }
 0x372   :  { %938 = vmatpush3.bf16.msra.mxu1 %v1004_v60 }
 0x373   :  { %939 = vmatprep.subr.bf16.mxu1 %v1144_v0 }
 0x376   :  { %940 = vmatpush3.bf16.msra.mxu1 %v1005_v61 }
 0x377   :  { %941 = vmatprep.subr.bf16.mxu1 %v1144_v0 }
 0x37a   :  { %942 = vmatpush3.bf16.msra.mxu1 %v1006_v62 }
 0x37b   :  { %943 = vmatprep.subr.bf16.mxu1 %v1144_v0 }
 0x37e   :  { %944 = vmatpush3.bf16.msra.mxu1 %v1007_v63 }
 0x37f   :  { %945 = vmatprep.subr.bf16.mxu1 %v1144_v0 }
 0x382   :  { %946 = vmatpush3.bf16.msra.mxu1 %v1008_v5 }
 0x383   :  { %947 = vmatprep.subr.bf16.mxu1 %v1144_v0  ;;  %v818_v0 = vld [vmem:[%s1493_s14] ss:$0 sm:$0xff]  ;;  %s1110_s14 = scalar_lea.vmem %s772_s30, 128 }
 0x384   :  { %p1111_p4 = scmp.ne.s32.totalorder %s772_s30, %s1110_s14  ;;  %p1116_p6 = scmp.lt.s32.totalorder %s1110_s14, %s1110_s14 }
 0x386   :  { %948 = vmatpush3.bf16.msra.mxu1 %v1009_v6  ;;  %p1117_p7 = por %p1116_p6, %p1115_p5 }
 0x388   :  { %p1118_p8 = pnand %p1117_p7, %p1111_p4 }
 0x43c   :  { %v456_v13 = vpop.f32.mrb[4].mxu1 }
 0x43d   :  { %v509_v15 = vadd.f32 %v508_v1, %v456_v13  ;;  %v923_v16 = vpop.f32.mrb[5].mxu1 }
 0x43e   :  { %v459_v17 = vpop.f32.mrb[6].mxu1 }
 0x43f   :  { %v521_v18 = vadd.f32 %v808_v14, %v509_v15  ;;  %v924_v19 = vpop.f32.mrb[7].mxu1 }
 0x441   :  { %v522_v20 = vmax.f32 %v521_v18, 0.0 }
 0x443   :  { %v523_v21 = vpack.c.bf16 %v522_v20, %v522_v20 }
 0x445   :  { %950 = vmatmul.mubr.bf16.vlgmr.msra.gmra.mrb[8].mxu1 %v523_v21 }
 0x518   :  { %v629_v25 = vpop.f32.mrb[8].mxu1 }
 0x519   :  { %v630_v26 = vadd.f32 %v809_v24, %v629_v25  ;;  %v951_v27 = vpop.f32.mrb[9].mxu1 }
 0x51a   :  { %v632_v28 = vpop.f32.mrb[10].mxu1 }
 0x51b   :  { %v635_v29 = vmax.f32 %v630_v26, 0.0  ;;  %v952_v30 = vpop.f32.mrb[11].mxu1 }
 0x51d   :  { %v636_v31 = vpack.c.bf16 %v635_v29, %v635_v29 }
 0x51f   :  { %970 = vmatmul.mubr.bf16.vlgmr.msra.gmra.mrb[12].mxu0 %v636_v31 }
 0x5f2   :  { %v742_v32 = vpop.f32.mrb[12].mxu0 }
 0x5f3   :  { %v743_v33 = vadd.f32 %v818_v0, %v742_v32  ;;  %v971_v34 = vpop.f32.mrb[13].mxu0 }
 0x5f4   :  { %v745_v35 = vpop.f32.mrb[14].mxu0 }
 0x5f5   :  { %1020 = vtanh.f32 %v743_v33  ;;  %v972_v36 = vpop.f32.mrb[15].mxu0 }
 0x5ff   :  { %v1021_v39 = vpop.eup %1020 }
 0x600   :  { %v750_v40 = vmul.f32 %v1021_v39, %v749_v37 }
 0x602   :  { %v760_v42 = vsel %vm759_vm4, %v750_v40, %v753_v38 }
 0x603   :  { %v762_v43 = vsel %vm761_vm5, %v760_v42, %v757_v41 }
 0x604   :  { %764 = vst.msk [vmem:[#allocation11] sm:$0xff] %vm763_vm6, %v762_v43 }
 0x605   :  { %1121 = shalt.err (!%p1118_p8)
}
 0x606   :  { %s1122_s18 = scalar_lea.hbm %s1494_s15, 128 }
 0x607   :  { %p1123_p9 = scmp.ne.s32.totalorder %s1494_s15, %s1122_s18  ;;  %p1126_p10 = scmp.lt.u32.totalorder %s1122_s18, %s1494_s15 }
 0x609   :  { %p1128_p11 = pnand %p1126_p10, %p1123_p9 }
 0x60b   :  { %1131 = shalt.err (!%p1128_p11)
}
 0x60c   :  { %774 = dma.vmem_to_hbm [thread:$0]  %s772_s30, 128, %s1494_s15, [#allocation5]  }
 0x60d   :  { %1138 = dma.done.wait [#allocation5], 128  }
 0x60e   :  { %1139 = vsyncadd [#allocation5], 4294967168 }
 0x60f   :  { %778 = vsyncpa [#allocation4], 1 }
 0x610   :  { %779 = vsyncpa [#allocation7], 1 }
 0x611   :  { %780 = vsyncpa [#allocation10], 1 }
 0x612   :  { %781 = vsyncpa [#allocation5], 1 }

</bundles_post_ra>
